<compile_context>
chip_gen: v5e
topology: v5e:2x2
jax: 0.10.0
libtpu: 0.0.40
codegen_flags: <defaults>
</compile_context>

<pallas_src>
import functools

import jax
import jax.numpy as jnp
from jax import lax
from jax.experimental import pallas as pl
from jax.experimental.pallas import tpu as pltpu


# ----------------------------------------------------------------------------
# Fused kernel: one grid step == TB batch elements.
# ----------------------------------------------------------------------------
def _fused_kernel(mask_ref, x_ref, wf_ref, bc_ref, wr_ref, br_ref, out_ref, op_ref,
                  *, H, W, TB, C, apply_lcn):
    """
    mask_ref : (9, TB*HW)          f32  0/1 tap-validity masks (batch-invariant, precomputed)
    x_ref    : (C, TB*HW)          f32  activations, channels on sublanes, batch*spatial on lanes
    wf_ref   : (C_mid, 9*C_in_bb)  bf16 fused conv weight, tap-major (k = ki*3+kj)
    bc_ref   : (C_mid, 1)          f32  conv bias
    wr_ref   : (C_mid, N_PAD)      f32  regressor weight (lane-padded to 128)
    br_ref   : (1, N_PAD)          f32  regressor bias   (lane-padded to 128)
    out_ref  : (1, TB, N_PAD)      f32  output rows for this batch tile
    op_ref   : (9*C_in_bb, TB*HW)  f32  scratch: stacked shifted-tap matmul operand
    """
    HW = H * W
    N = TB * HW
    C_in_bb = 2 * C if apply_lcn else C

    taps = [(di, dj) for di in (-1, 0, 1) for dj in (-1, 0, 1)]
    offs = [di * W + dj for di, dj in taps]

    x = x_ref[...]                                      # (C, N) f32
    mask = mask_ref[...]                                # (9, N) f32

    def shifted(a, k):
        # out[:, g] = a[:, g + offs[k]] where valid, else 0 (zero-padding semantics).
        off = offs[k]
        if off == 0:
            return a                                    # center tap: mask is all-ones
        v = pltpu.roll(a, shift=(-off) % N, axis=1)     # XLU lane rotation, wrap gets masked
        return v * mask[k:k + 1, :]

    # ---- LCN: 3x3 box window, zero padding: (x - mean) / (std + 1e-6), all f32 ----
    if apply_lcn:
        s = jnp.zeros_like(x)
        ss = jnp.zeros_like(x)
        for k in range(9):
            v = shifted(x, k)
            s = s + v
            ss = ss + v * v
        mean = s * (1.0 / 9.0)
        var = jnp.maximum(ss * (1.0 / 9.0) - mean * mean, 0.0)
        lcn = (x - mean) / (jnp.sqrt(var) + 1e-6)       # exact divide (accuracy concern)
        xin = jnp.concatenate([x, lcn], axis=0)         # (C_in_bb, N) == cat([x, lcn], dim=1)
    else:
        xin = x

    # ---- stack the 9 shifted taps of the concatenated input into the staging scratch ----
    for k in range(9):
        op_ref[k * C_in_bb:(k + 1) * C_in_bb, :] = shifted(xin, k)

    # ---- conv3x3 (pad=1) as ONE fused MXU matmul: (C_mid, 9*C_in_bb) @ (9*C_in_bb, N) ----
    acc = jnp.dot(wf_ref[...], op_ref[...].astype(jnp.bfloat16),
                  preferred_element_type=jnp.float32)   # (C_mid, N) f32 accumulate
    h = jnp.maximum(acc + bc_ref[...], 0.0)             # bias + ReLU, f32

    # ---- regressor: per-batch-element global average pool + linear head (tiny -> VPU) ----
    rows = []
    for t in range(TB):
        pooled = jnp.mean(h[:, t * HW:(t + 1) * HW], axis=1, keepdims=True)   # (C_mid, 1)
        rows.append(jnp.sum(pooled * wr_ref[...], axis=0, keepdims=True) + br_ref[...])
    out_ref[0] = jnp.concatenate(rows, axis=0)          # (TB, N_PAD) lane-dense store


# ----------------------------------------------------------------------------
# Wrapper: one-time weight fusion / layout plumbing + pallas_call.
# ----------------------------------------------------------------------------
@functools.partial(jax.jit, static_argnames=("apply_lcn",))
def composite_model_forward(x, params, apply_lcn=True):
    x = x.astype(jnp.float32)
    B, C, H, W = x.shape
    HW = H * W

    # Batch tile: biggest power-of-two divisor of B (<= 8); keep >= 2 grid steps when
    # possible so both v7x TensorCores get work.
    TB = 1
    for cand in (8, 4, 2):
        if B % cand == 0:
            TB = cand
            break
    while TB > 1 and B // TB < 2:
        TB //= 2
    G = B // TB
    N = TB * HW

    w_conv = params["w_conv"].astype(jnp.float32)       # PyTorch layout (C_mid, C_in_bb, 3, 3)
    C_mid, C_in_bb = w_conv.shape[0], w_conv.shape[1]
    assert C_in_bb == (2 * C if apply_lcn else C)
    n_out = params["w_reg"].shape[1]
    N_PAD = max(128, ((n_out + 127) // 128) * 128)      # lane-dense head output
    K9 = 9 * C_in_bb

    # Fused conv weight: W_fused[o, k*C_in_bb + c] = W[o, c, ki, kj], k = ki*3 + kj.
    # Pre-cast to bf16 once (no per-step VPU re-cast, half the weight DMA).
    w_fused = jnp.transpose(w_conv, (0, 2, 3, 1)).reshape(C_mid, K9).astype(jnp.bfloat16)
    b_conv = params["b_conv"].astype(jnp.float32).reshape(C_mid, 1)
    w_reg = jnp.zeros((C_mid, N_PAD), jnp.float32).at[:, :n_out].set(
        params["w_reg"].astype(jnp.float32))
    b_reg = jnp.zeros((1, N_PAD), jnp.float32).at[:, :n_out].set(
        params["b_reg"].astype(jnp.float32).reshape(1, n_out))

    # Lane-dense activation layout: channels on sublanes, batch*spatial on lanes.
    x_r = jnp.transpose(x, (1, 0, 2, 3)).reshape(C, B * HW)

    # Batch-invariant tap-validity masks, computed once (not per grid step).
    p = jnp.arange(HW, dtype=jnp.int32)
    row, col = p // W, p % W
    m_list = []
    for di in (-1, 0, 1):
        for dj in (-1, 0, 1):
            m_list.append((row + di >= 0) & (row + di < H) & (col + dj >= 0) & (col + dj < W))
    mask = jnp.tile(jnp.stack(m_list, 0).astype(jnp.float32), (1, TB))    # (9, N)

    kernel = functools.partial(_fused_kernel, H=H, W=W, TB=TB, C=C, apply_lcn=apply_lcn)
    out = pl.pallas_call(
        kernel,
        out_shape=jax.ShapeDtypeStruct((G, TB, N_PAD), jnp.float32),
        grid=(G,),
        in_specs=[
            pl.BlockSpec((9, N), lambda b: (0, 0)),
            pl.BlockSpec((C, N), lambda b: (0, b)),
            pl.BlockSpec((C_mid, K9), lambda b: (0, 0)),
            pl.BlockSpec((C_mid, 1), lambda b: (0, 0)),
            pl.BlockSpec((C_mid, N_PAD), lambda b: (0, 0)),
            pl.BlockSpec((1, N_PAD), lambda b: (0, 0)),
        ],
        out_specs=pl.BlockSpec((1, TB, N_PAD), lambda b: (b, 0, 0)),
        scratch_shapes=[pltpu.VMEM((K9, N), jnp.float32)],
        compiler_params=pltpu.CompilerParams(dimension_semantics=("parallel",)),
    )(mask, x_r, w_fused, b_conv, w_reg, b_reg)
    return out.reshape(B, N_PAD)[:, :n_out]


# ----------------------------------------------------------------------------
# Pure-JAX reference (mirrors the kernel's MXU numerics: bf16 conv operands,
# f32 accumulation; LCN / bias / ReLU / pooling / head in f32).
# ----------------------------------------------------------------------------
def reference_forward(x, params, apply_lcn=True):
    x = x.astype(jnp.float32)
    B, C, H, W = x.shape
    if apply_lcn:
        xp = jnp.pad(x, ((0, 0), (0, 0), (1, 1), (1, 1)))
        s = jnp.zeros_like(x)
        ss = jnp.zeros_like(x)
        for di in range(3):
            for dj in range(3):
                v = xp[:, :, di:di + H, dj:dj + W]
                s = s + v
                ss = ss + v * v
        mean = s / 9.0
        std = jnp.sqrt(jnp.maximum(ss / 9.0 - mean * mean, 0.0))
        lcn = (x - mean) / (std + 1e-6)
        xin = jnp.concatenate([x, lcn], axis=1)
    else:
        xin = x
    w = params["w_conv"].astype(jnp.float32)
    xin_b = xin.astype(jnp.bfloat16).astype(jnp.float32)
    w_b = w.astype(jnp.bfloat16).astype(jnp.float32)
    h = lax.conv_general_dilated(
        xin_b, w_b, window_strides=(1, 1), padding=((1, 1), (1, 1)),
        dimension_numbers=("NCHW", "OIHW", "NCHW"),
        precision=lax.Precision.HIGHEST)
    h = h + params["b_conv"].astype(jnp.float32).reshape(1, -1, 1, 1)
    h = jnp.maximum(h, 0.0)
    pooled = jnp.mean(h, axis=(2, 3))                   # (B, C_mid)
    out = jnp.dot(pooled, params["w_reg"].astype(jnp.float32),
                  precision=lax.Precision.HIGHEST)
    return out + params["b_reg"].astype(jnp.float32)[None, :]


if __name__ == "__main__":
    # Small shapes consistent with the module's forward (NCHW image input).
    # B=8 exercises the batch tiling (TB=4, grid=(2,)).
    B, C, H, W = 8, 4, 16, 16
    C_IN_BB = 2 * C        # backbone input channels after cat([x, lcn], dim=1)
    C_MID = 16             # backbone output channels
    N_OUT = 8              # regressor output size

    key = jax.random.PRNGKey(0)
    kx, kw1, kb1, kw2, kb2 = jax.random.split(key, 5)

    x = jax.random.normal(kx, (B, C, H, W), dtype=jnp.float32)
    params = {
        # PyTorch-native parameter layouts.
        "w_conv": 0.1 * jax.random.normal(kw1, (C_MID, C_IN_BB, 3, 3), dtype=jnp.float32),
        "b_conv": 0.1 * jax.random.normal(kb1, (C_MID,), dtype=jnp.float32),
        "w_reg": 0.1 * jax.random.normal(kw2, (C_MID, N_OUT), dtype=jnp.float32),
        "b_reg": 0.1 * jax.random.normal(kb2, (N_OUT,), dtype=jnp.float32),
    }

    out = composite_model_forward(x, params, apply_lcn=True)
    out = jax.block_until_ready(out)

    ref = reference_forward(x, params, apply_lcn=True)
    assert out.shape == (B, N_OUT), out.shape
    assert jnp.allclose(out, ref, atol=5e-3, rtol=5e-3), (out, ref)

    print("KERNEL_OK")
</pallas_src>

<mosaic_0001>
module attributes {stable_mosaic.version = 11 : i64} {
  func.func @_fused_kernel(%arg0: i32, %arg1: memref<9x1024xf32, #tpu.memory_space<vmem>>, %arg2: memref<4x1024xf32, #tpu.memory_space<vmem>>, %arg3: memref<16x72xbf16, #tpu.memory_space<vmem>>, %arg4: memref<16x1xf32, #tpu.memory_space<vmem>>, %arg5: memref<16x128xf32, #tpu.memory_space<vmem>>, %arg6: memref<1x128xf32, #tpu.memory_space<vmem>>, %arg7: memref<1x4x128xf32, #tpu.memory_space<vmem>>, %arg8: memref<72x1024xf32, #tpu.memory_space<vmem>>) attributes {dimension_semantics = [#tpu.dimension_semantics<parallel>], iteration_bounds = array<i64: 2>, scalar_prefetch = 0 : i64, scratch_operands = 1 : i64, tpu.core_type = #tpu.core_type<tc>, window_params = [{pipeline_mode = #tpu.pipeline_mode<synchronous>, transform_indices = @transform_0, window_bounds = array<i64: 9, 1024>}, {transform_indices = @transform_1, window_bounds = array<i64: 4, 1024>}, {pipeline_mode = #tpu.pipeline_mode<synchronous>, transform_indices = @transform_2, window_bounds = array<i64: 16, 72>}, {pipeline_mode = #tpu.pipeline_mode<synchronous>, transform_indices = @transform_3, window_bounds = array<i64: 16, 1>}, {pipeline_mode = #tpu.pipeline_mode<synchronous>, transform_indices = @transform_4, window_bounds = array<i64: 16, 128>}, {pipeline_mode = #tpu.pipeline_mode<synchronous>, transform_indices = @transform_5, window_bounds = array<i64: 1, 128>}, {transform_indices = @transform_6, window_bounds = array<i64: 1, 4, 128>}]} {
    %c0 = arith.constant 0 : index
    %c0_0 = arith.constant 0 : index
    %0 = vector.load %arg2[%c0, %c0_0] : memref<4x1024xf32, #tpu.memory_space<vmem>>, vector<4x1024xf32>
    %c0_1 = arith.constant 0 : index
    %c0_2 = arith.constant 0 : index
    %1 = vector.load %arg1[%c0_1, %c0_2] : memref<9x1024xf32, #tpu.memory_space<vmem>>, vector<9x1024xf32>
    %cst = arith.constant 0.000000e+00 : f32
    %2 = vector.broadcast %cst : f32 to vector<4x1024xf32>
    %cst_3 = arith.constant 0.000000e+00 : f32
    %3 = vector.broadcast %cst_3 : f32 to vector<4x1024xf32>
    %c17_i32 = arith.constant 17 : i32
    %4 = tpu.dynamic_rotate %0 by %c17_i32 dim 1 : vector<4x1024xf32>, i32 -> vector<4x1024xf32>
    %5 = vector.extract_strided_slice %1 {offsets = [0, 0], sizes = [1, 1024], strides = [1, 1]} : vector<9x1024xf32> to vector<1x1024xf32>
    %6 = vector.broadcast %5 : vector<1x1024xf32> to vector<4x1024xf32>
    %7 = arith.mulf %4, %6 : vector<4x1024xf32>
    %8 = arith.addf %2, %7 : vector<4x1024xf32>
    %9 = arith.mulf %7, %7 : vector<4x1024xf32>
    %10 = arith.addf %3, %9 : vector<4x1024xf32>
    %c16_i32 = arith.constant 16 : i32
    %11 = tpu.dynamic_rotate %0 by %c16_i32 dim 1 : vector<4x1024xf32>, i32 -> vector<4x1024xf32>
    %12 = vector.extract_strided_slice %1 {offsets = [1, 0], sizes = [1, 1024], strides = [1, 1]} : vector<9x1024xf32> to vector<1x1024xf32>
    %13 = vector.broadcast %12 : vector<1x1024xf32> to vector<4x1024xf32>
    %14 = arith.mulf %11, %13 : vector<4x1024xf32>
    %15 = arith.addf %8, %14 : vector<4x1024xf32>
    %16 = arith.mulf %14, %14 : vector<4x1024xf32>
    %17 = arith.addf %10, %16 : vector<4x1024xf32>
    %c15_i32 = arith.constant 15 : i32
    %18 = tpu.dynamic_rotate %0 by %c15_i32 dim 1 : vector<4x1024xf32>, i32 -> vector<4x1024xf32>
    %19 = vector.extract_strided_slice %1 {offsets = [2, 0], sizes = [1, 1024], strides = [1, 1]} : vector<9x1024xf32> to vector<1x1024xf32>
    %20 = vector.broadcast %19 : vector<1x1024xf32> to vector<4x1024xf32>
    %21 = arith.mulf %18, %20 : vector<4x1024xf32>
    %22 = arith.addf %15, %21 : vector<4x1024xf32>
    %23 = arith.mulf %21, %21 : vector<4x1024xf32>
    %24 = arith.addf %17, %23 : vector<4x1024xf32>
    %c1_i32 = arith.constant 1 : i32
    %25 = tpu.dynamic_rotate %0 by %c1_i32 dim 1 : vector<4x1024xf32>, i32 -> vector<4x1024xf32>
    %26 = vector.extract_strided_slice %1 {offsets = [3, 0], sizes = [1, 1024], strides = [1, 1]} : vector<9x1024xf32> to vector<1x1024xf32>
    %27 = vector.broadcast %26 : vector<1x1024xf32> to vector<4x1024xf32>
    %28 = arith.mulf %25, %27 : vector<4x1024xf32>
    %29 = arith.addf %22, %28 : vector<4x1024xf32>
    %30 = arith.mulf %28, %28 : vector<4x1024xf32>
    %31 = arith.addf %24, %30 : vector<4x1024xf32>
    %32 = arith.addf %29, %0 : vector<4x1024xf32>
    %33 = arith.mulf %0, %0 : vector<4x1024xf32>
    %34 = arith.addf %31, %33 : vector<4x1024xf32>
    %c1023_i32 = arith.constant 1023 : i32
    %35 = tpu.dynamic_rotate %0 by %c1023_i32 dim 1 : vector<4x1024xf32>, i32 -> vector<4x1024xf32>
    %36 = vector.extract_strided_slice %1 {offsets = [5, 0], sizes = [1, 1024], strides = [1, 1]} : vector<9x1024xf32> to vector<1x1024xf32>
    %37 = vector.broadcast %36 : vector<1x1024xf32> to vector<4x1024xf32>
    %38 = arith.mulf %35, %37 : vector<4x1024xf32>
    %39 = arith.addf %32, %38 : vector<4x1024xf32>
    %40 = arith.mulf %38, %38 : vector<4x1024xf32>
    %41 = arith.addf %34, %40 : vector<4x1024xf32>
    %c1009_i32 = arith.constant 1009 : i32
    %42 = tpu.dynamic_rotate %0 by %c1009_i32 dim 1 : vector<4x1024xf32>, i32 -> vector<4x1024xf32>
    %43 = vector.extract_strided_slice %1 {offsets = [6, 0], sizes = [1, 1024], strides = [1, 1]} : vector<9x1024xf32> to vector<1x1024xf32>
    %44 = vector.broadcast %43 : vector<1x1024xf32> to vector<4x1024xf32>
    %45 = arith.mulf %42, %44 : vector<4x1024xf32>
    %46 = arith.addf %39, %45 : vector<4x1024xf32>
    %47 = arith.mulf %45, %45 : vector<4x1024xf32>
    %48 = arith.addf %41, %47 : vector<4x1024xf32>
    %c1008_i32 = arith.constant 1008 : i32
    %49 = tpu.dynamic_rotate %0 by %c1008_i32 dim 1 : vector<4x1024xf32>, i32 -> vector<4x1024xf32>
    %50 = vector.extract_strided_slice %1 {offsets = [7, 0], sizes = [1, 1024], strides = [1, 1]} : vector<9x1024xf32> to vector<1x1024xf32>
    %51 = vector.broadcast %50 : vector<1x1024xf32> to vector<4x1024xf32>
    %52 = arith.mulf %49, %51 : vector<4x1024xf32>
    %53 = arith.addf %46, %52 : vector<4x1024xf32>
    %54 = arith.mulf %52, %52 : vector<4x1024xf32>
    %55 = arith.addf %48, %54 : vector<4x1024xf32>
    %c1007_i32 = arith.constant 1007 : i32
    %56 = tpu.dynamic_rotate %0 by %c1007_i32 dim 1 : vector<4x1024xf32>, i32 -> vector<4x1024xf32>
    %57 = vector.extract_strided_slice %1 {offsets = [8, 0], sizes = [1, 1024], strides = [1, 1]} : vector<9x1024xf32> to vector<1x1024xf32>
    %58 = vector.broadcast %57 : vector<1x1024xf32> to vector<4x1024xf32>
    %59 = arith.mulf %56, %58 : vector<4x1024xf32>
    %60 = arith.addf %53, %59 : vector<4x1024xf32>
    %61 = arith.mulf %59, %59 : vector<4x1024xf32>
    %62 = arith.addf %55, %61 : vector<4x1024xf32>
    %cst_4 = arith.constant 0.111111112 : f32
    %63 = vector.broadcast %cst_4 : f32 to vector<4x1024xf32>
    %64 = arith.mulf %60, %63 : vector<4x1024xf32>
    %cst_5 = arith.constant 0.111111112 : f32
    %65 = vector.broadcast %cst_5 : f32 to vector<4x1024xf32>
    %66 = arith.mulf %62, %65 : vector<4x1024xf32>
    %67 = arith.mulf %64, %64 : vector<4x1024xf32>
    %68 = arith.subf %66, %67 : vector<4x1024xf32>
    %cst_6 = arith.constant 0.000000e+00 : f32
    %69 = vector.broadcast %cst_6 : f32 to vector<4x1024xf32>
    %70 = arith.maximumf %68, %69 : vector<4x1024xf32>
    %71 = arith.subf %0, %64 : vector<4x1024xf32>
    %72 = math.sqrt %70 : vector<4x1024xf32>
    %cst_7 = arith.constant 9.99999997E-7 : f32
    %73 = vector.broadcast %cst_7 : f32 to vector<4x1024xf32>
    %74 = arith.addf %72, %73 : vector<4x1024xf32>
    %75 = arith.divf %71, %74 : vector<4x1024xf32>
    %76 = tpu.concatenate %0, %75 in 0 : vector<4x1024xf32>, vector<4x1024xf32> -> vector<8x1024xf32>
    %c17_i32_8 = arith.constant 17 : i32
    %77 = tpu.dynamic_rotate %76 by %c17_i32_8 dim 1 : vector<8x1024xf32>, i32 -> vector<8x1024xf32>
    %78 = vector.extract_strided_slice %1 {offsets = [0, 0], sizes = [1, 1024], strides = [1, 1]} : vector<9x1024xf32> to vector<1x1024xf32>
    %79 = vector.broadcast %78 : vector<1x1024xf32> to vector<8x1024xf32>
    %80 = arith.mulf %77, %79 : vector<8x1024xf32>
    %c0_9 = arith.constant 0 : index
    %c0_10 = arith.constant 0 : index
    %81 = vector.load %arg8[%c0_9, %c0_10] : memref<72x1024xf32, #tpu.memory_space<vmem>>, vector<8x1024xf32>
    tpu.vector_store %arg8[%c0_9, %c0_10], %80 {strides = array<i32>} : memref<72x1024xf32, #tpu.memory_space<vmem>>, vector<8x1024xf32>,
    %c16_i32_11 = arith.constant 16 : i32
    %82 = tpu.dynamic_rotate %76 by %c16_i32_11 dim 1 : vector<8x1024xf32>, i32 -> vector<8x1024xf32>
    %83 = vector.extract_strided_slice %1 {offsets = [1, 0], sizes = [1, 1024], strides = [1, 1]} : vector<9x1024xf32> to vector<1x1024xf32>
    %84 = vector.broadcast %83 : vector<1x1024xf32> to vector<8x1024xf32>
    %85 = arith.mulf %82, %84 : vector<8x1024xf32>
    %c8 = arith.constant 8 : index
    %c0_12 = arith.constant 0 : index
    %86 = vector.load %arg8[%c8, %c0_12] : memref<72x1024xf32, #tpu.memory_space<vmem>>, vector<8x1024xf32>
    tpu.vector_store %arg8[%c8, %c0_12], %85 {strides = array<i32>} : memref<72x1024xf32, #tpu.memory_space<vmem>>, vector<8x1024xf32>,
    %c15_i32_13 = arith.constant 15 : i32
    %87 = tpu.dynamic_rotate %76 by %c15_i32_13 dim 1 : vector<8x1024xf32>, i32 -> vector<8x1024xf32>
    %88 = vector.extract_strided_slice %1 {offsets = [2, 0], sizes = [1, 1024], strides = [1, 1]} : vector<9x1024xf32> to vector<1x1024xf32>
    %89 = vector.broadcast %88 : vector<1x1024xf32> to vector<8x1024xf32>
    %90 = arith.mulf %87, %89 : vector<8x1024xf32>
    %c16 = arith.constant 16 : index
    %c0_14 = arith.constant 0 : index
    %91 = vector.load %arg8[%c16, %c0_14] : memref<72x1024xf32, #tpu.memory_space<vmem>>, vector<8x1024xf32>
    tpu.vector_store %arg8[%c16, %c0_14], %90 {strides = array<i32>} : memref<72x1024xf32, #tpu.memory_space<vmem>>, vector<8x1024xf32>,
    %c1_i32_15 = arith.constant 1 : i32
    %92 = tpu.dynamic_rotate %76 by %c1_i32_15 dim 1 : vector<8x1024xf32>, i32 -> vector<8x1024xf32>
    %93 = vector.extract_strided_slice %1 {offsets = [3, 0], sizes = [1, 1024], strides = [1, 1]} : vector<9x1024xf32> to vector<1x1024xf32>
    %94 = vector.broadcast %93 : vector<1x1024xf32> to vector<8x1024xf32>
    %95 = arith.mulf %92, %94 : vector<8x1024xf32>
    %c24 = arith.constant 24 : index
    %c0_16 = arith.constant 0 : index
    %96 = vector.load %arg8[%c24, %c0_16] : memref<72x1024xf32, #tpu.memory_space<vmem>>, vector<8x1024xf32>
    tpu.vector_store %arg8[%c24, %c0_16], %95 {strides = array<i32>} : memref<72x1024xf32, #tpu.memory_space<vmem>>, vector<8x1024xf32>,
    %c32 = arith.constant 32 : index
    %c0_17 = arith.constant 0 : index
    %97 = vector.load %arg8[%c32, %c0_17] : memref<72x1024xf32, #tpu.memory_space<vmem>>, vector<8x1024xf32>
    tpu.vector_store %arg8[%c32, %c0_17], %76 {strides = array<i32>} : memref<72x1024xf32, #tpu.memory_space<vmem>>, vector<8x1024xf32>,
    %c1023_i32_18 = arith.constant 1023 : i32
    %98 = tpu.dynamic_rotate %76 by %c1023_i32_18 dim 1 : vector<8x1024xf32>, i32 -> vector<8x1024xf32>
    %99 = vector.extract_strided_slice %1 {offsets = [5, 0], sizes = [1, 1024], strides = [1, 1]} : vector<9x1024xf32> to vector<1x1024xf32>
    %100 = vector.broadcast %99 : vector<1x1024xf32> to vector<8x1024xf32>
    %101 = arith.mulf %98, %100 : vector<8x1024xf32>
    %c40 = arith.constant 40 : index
    %c0_19 = arith.constant 0 : index
    %102 = vector.load %arg8[%c40, %c0_19] : memref<72x1024xf32, #tpu.memory_space<vmem>>, vector<8x1024xf32>
    tpu.vector_store %arg8[%c40, %c0_19], %101 {strides = array<i32>} : memref<72x1024xf32, #tpu.memory_space<vmem>>, vector<8x1024xf32>,
    %c1009_i32_20 = arith.constant 1009 : i32
    %103 = tpu.dynamic_rotate %76 by %c1009_i32_20 dim 1 : vector<8x1024xf32>, i32 -> vector<8x1024xf32>
    %104 = vector.extract_strided_slice %1 {offsets = [6, 0], sizes = [1, 1024], strides = [1, 1]} : vector<9x1024xf32> to vector<1x1024xf32>
    %105 = vector.broadcast %104 : vector<1x1024xf32> to vector<8x1024xf32>
    %106 = arith.mulf %103, %105 : vector<8x1024xf32>
    %c48 = arith.constant 48 : index
    %c0_21 = arith.constant 0 : index
    %107 = vector.load %arg8[%c48, %c0_21] : memref<72x1024xf32, #tpu.memory_space<vmem>>, vector<8x1024xf32>
    tpu.vector_store %arg8[%c48, %c0_21], %106 {strides = array<i32>} : memref<72x1024xf32, #tpu.memory_space<vmem>>, vector<8x1024xf32>,
    %c1008_i32_22 = arith.constant 1008 : i32
    %108 = tpu.dynamic_rotate %76 by %c1008_i32_22 dim 1 : vector<8x1024xf32>, i32 -> vector<8x1024xf32>
    %109 = vector.extract_strided_slice %1 {offsets = [7, 0], sizes = [1, 1024], strides = [1, 1]} : vector<9x1024xf32> to vector<1x1024xf32>
    %110 = vector.broadcast %109 : vector<1x1024xf32> to vector<8x1024xf32>
    %111 = arith.mulf %108, %110 : vector<8x1024xf32>
    %c56 = arith.constant 56 : index
    %c0_23 = arith.constant 0 : index
    %112 = vector.load %arg8[%c56, %c0_23] : memref<72x1024xf32, #tpu.memory_space<vmem>>, vector<8x1024xf32>
    tpu.vector_store %arg8[%c56, %c0_23], %111 {strides = array<i32>} : memref<72x1024xf32, #tpu.memory_space<vmem>>, vector<8x1024xf32>,
    %c1007_i32_24 = arith.constant 1007 : i32
    %113 = tpu.dynamic_rotate %76 by %c1007_i32_24 dim 1 : vector<8x1024xf32>, i32 -> vector<8x1024xf32>
    %114 = vector.extract_strided_slice %1 {offsets = [8, 0], sizes = [1, 1024], strides = [1, 1]} : vector<9x1024xf32> to vector<1x1024xf32>
    %115 = vector.broadcast %114 : vector<1x1024xf32> to vector<8x1024xf32>
    %116 = arith.mulf %113, %115 : vector<8x1024xf32>
    %c64 = arith.constant 64 : index
    %c0_25 = arith.constant 0 : index
    %117 = vector.load %arg8[%c64, %c0_25] : memref<72x1024xf32, #tpu.memory_space<vmem>>, vector<8x1024xf32>
    tpu.vector_store %arg8[%c64, %c0_25], %116 {strides = array<i32>} : memref<72x1024xf32, #tpu.memory_space<vmem>>, vector<8x1024xf32>,
    %c0_26 = arith.constant 0 : index
    %c0_27 = arith.constant 0 : index
    %118 = vector.load %arg3[%c0_26, %c0_27] : memref<16x72xbf16, #tpu.memory_space<vmem>>, vector<16x72xbf16>
    %c0_28 = arith.constant 0 : index
    %c0_29 = arith.constant 0 : index
    %119 = vector.load %arg8[%c0_28, %c0_29] : memref<72x1024xf32, #tpu.memory_space<vmem>>, vector<72x1024xf32>
    %120 = arith.truncf %119 : vector<72x1024xf32> to vector<72x1024xbf16>
    %cst_30 = arith.constant dense<0.000000e+00> : vector<16x1024xf32>
    %121 = tpu.matmul %118, %120, %cst_30 {dimension_numbers = #tpu.dot_dimension_numbers<[1], [0], [0], [1], [0, 0, 1, 1], [], []>} : vector<16x72xbf16>, vector<72x1024xbf16>, vector<16x1024xf32> -> vector<16x1024xf32>
    %c0_31 = arith.constant 0 : index
    %c0_32 = arith.constant 0 : index
    %122 = vector.load %arg4[%c0_31, %c0_32] : memref<16x1xf32, #tpu.memory_space<vmem>>, vector<16x1xf32>
    %123 = vector.broadcast %122 : vector<16x1xf32> to vector<16x1024xf32>
    %124 = arith.addf %121, %123 : vector<16x1024xf32>
    %cst_33 = arith.constant 0.000000e+00 : f32
    %125 = vector.broadcast %cst_33 : f32 to vector<16x1024xf32>
    %126 = arith.maximumf %124, %125 : vector<16x1024xf32>
    %127 = vector.extract_strided_slice %126 {offsets = [0, 0], sizes = [16, 256], strides = [1, 1]} : vector<16x1024xf32> to vector<16x256xf32>
    %cst_34 = arith.constant dense<0.000000e+00> : vector<16xf32>
    %128 = vector.multi_reduction <add>, %127, %cst_34 [1] : vector<16x256xf32> to vector<16xf32>
    %129 = vector.shape_cast %128 : vector<16xf32> to vector<16x1xf32>
    %cst_35 = arith.constant 2.560000e+02 : f32
    %130 = vector.broadcast %cst_35 : f32 to vector<16x1xf32>
    %131 = arith.divf %129, %130 : vector<16x1xf32>
    %c0_36 = arith.constant 0 : index
    %c0_37 = arith.constant 0 : index
    %132 = vector.load %arg5[%c0_36, %c0_37] : memref<16x128xf32, #tpu.memory_space<vmem>>, vector<16x128xf32>
    %133 = vector.broadcast %131 : vector<16x1xf32> to vector<16x128xf32>
    %134 = arith.mulf %133, %132 : vector<16x128xf32>
    %cst_38 = arith.constant dense<0.000000e+00> : vector<128xf32>
    %135 = vector.multi_reduction <add>, %134, %cst_38 [0] : vector<16x128xf32> to vector<128xf32>
    %136 = vector.shape_cast %135 : vector<128xf32> to vector<1x128xf32>
    %c0_39 = arith.constant 0 : index
    %c0_40 = arith.constant 0 : index
    %137 = vector.load %arg6[%c0_39, %c0_40] : memref<1x128xf32, #tpu.memory_space<vmem>>, vector<1x128xf32>
    %138 = arith.addf %136, %137 : vector<1x128xf32>
    %139 = vector.extract_strided_slice %126 {offsets = [0, 256], sizes = [16, 256], strides = [1, 1]} : vector<16x1024xf32> to vector<16x256xf32>
    %cst_41 = arith.constant dense<0.000000e+00> : vector<16xf32>
    %140 = vector.multi_reduction <add>, %139, %cst_41 [1] : vector<16x256xf32> to vector<16xf32>
    %141 = vector.shape_cast %140 : vector<16xf32> to vector<16x1xf32>
    %cst_42 = arith.constant 2.560000e+02 : f32
    %142 = vector.broadcast %cst_42 : f32 to vector<16x1xf32>
    %143 = arith.divf %141, %142 : vector<16x1xf32>
    %c0_43 = arith.constant 0 : index
    %c0_44 = arith.constant 0 : index
    %144 = vector.load %arg5[%c0_43, %c0_44] : memref<16x128xf32, #tpu.memory_space<vmem>>, vector<16x128xf32>
    %145 = vector.broadcast %143 : vector<16x1xf32> to vector<16x128xf32>
    %146 = arith.mulf %145, %144 : vector<16x128xf32>
    %cst_45 = arith.constant dense<0.000000e+00> : vector<128xf32>
    %147 = vector.multi_reduction <add>, %146, %cst_45 [0] : vector<16x128xf32> to vector<128xf32>
    %148 = vector.shape_cast %147 : vector<128xf32> to vector<1x128xf32>
    %c0_46 = arith.constant 0 : index
    %c0_47 = arith.constant 0 : index
    %149 = vector.load %arg6[%c0_46, %c0_47] : memref<1x128xf32, #tpu.memory_space<vmem>>, vector<1x128xf32>
    %150 = arith.addf %148, %149 : vector<1x128xf32>
    %151 = vector.extract_strided_slice %126 {offsets = [0, 512], sizes = [16, 256], strides = [1, 1]} : vector<16x1024xf32> to vector<16x256xf32>
    %cst_48 = arith.constant dense<0.000000e+00> : vector<16xf32>
    %152 = vector.multi_reduction <add>, %151, %cst_48 [1] : vector<16x256xf32> to vector<16xf32>
    %153 = vector.shape_cast %152 : vector<16xf32> to vector<16x1xf32>
    %cst_49 = arith.constant 2.560000e+02 : f32
    %154 = vector.broadcast %cst_49 : f32 to vector<16x1xf32>
    %155 = arith.divf %153, %154 : vector<16x1xf32>
    %c0_50 = arith.constant 0 : index
    %c0_51 = arith.constant 0 : index
    %156 = vector.load %arg5[%c0_50, %c0_51] : memref<16x128xf32, #tpu.memory_space<vmem>>, vector<16x128xf32>
    %157 = vector.broadcast %155 : vector<16x1xf32> to vector<16x128xf32>
    %158 = arith.mulf %157, %156 : vector<16x128xf32>
    %cst_52 = arith.constant dense<0.000000e+00> : vector<128xf32>
    %159 = vector.multi_reduction <add>, %158, %cst_52 [0] : vector<16x128xf32> to vector<128xf32>
    %160 = vector.shape_cast %159 : vector<128xf32> to vector<1x128xf32>
    %c0_53 = arith.constant 0 : index
    %c0_54 = arith.constant 0 : index
    %161 = vector.load %arg6[%c0_53, %c0_54] : memref<1x128xf32, #tpu.memory_space<vmem>>, vector<1x128xf32>
    %162 = arith.addf %160, %161 : vector<1x128xf32>
    %163 = vector.extract_strided_slice %126 {offsets = [0, 768], sizes = [16, 256], strides = [1, 1]} : vector<16x1024xf32> to vector<16x256xf32>
    %cst_55 = arith.constant dense<0.000000e+00> : vector<16xf32>
    %164 = vector.multi_reduction <add>, %163, %cst_55 [1] : vector<16x256xf32> to vector<16xf32>
    %165 = vector.shape_cast %164 : vector<16xf32> to vector<16x1xf32>
    %cst_56 = arith.constant 2.560000e+02 : f32
    %166 = vector.broadcast %cst_56 : f32 to vector<16x1xf32>
    %167 = arith.divf %165, %166 : vector<16x1xf32>
    %c0_57 = arith.constant 0 : index
    %c0_58 = arith.constant 0 : index
    %168 = vector.load %arg5[%c0_57, %c0_58] : memref<16x128xf32, #tpu.memory_space<vmem>>, vector<16x128xf32>
    %169 = vector.broadcast %167 : vector<16x1xf32> to vector<16x128xf32>
    %170 = arith.mulf %169, %168 : vector<16x128xf32>
    %cst_59 = arith.constant dense<0.000000e+00> : vector<128xf32>
    %171 = vector.multi_reduction <add>, %170, %cst_59 [0] : vector<16x128xf32> to vector<128xf32>
    %172 = vector.shape_cast %171 : vector<128xf32> to vector<1x128xf32>
    %c0_60 = arith.constant 0 : index
    %c0_61 = arith.constant 0 : index
    %173 = vector.load %arg6[%c0_60, %c0_61] : memref<1x128xf32, #tpu.memory_space<vmem>>, vector<1x128xf32>
    %174 = arith.addf %172, %173 : vector<1x128xf32>
    %175 = tpu.concatenate %138, %150, %162, %174 in 0 : vector<1x128xf32>, vector<1x128xf32>, vector<1x128xf32>, vector<1x128xf32> -> vector<4x128xf32>
    %c0_62 = arith.constant 0 : index
    %c0_63 = arith.constant 0 : index
    %c0_64 = arith.constant 0 : index
    %176 = vector.load %arg7[%c0_62, %c0_63, %c0_64] : memref<1x4x128xf32, #tpu.memory_space<vmem>>, vector<1x4x128xf32>
    %177 = vector.shape_cast %176 : vector<1x4x128xf32> to vector<4x128xf32>
    %178 = vector.shape_cast %175 : vector<4x128xf32> to vector<1x4x128xf32>
    tpu.vector_store %arg7[%c0_62, %c0_63, %c0_64], %178 {strides = array<i32>} : memref<1x4x128xf32, #tpu.memory_space<vmem>>, vector<1x4x128xf32>,
    return
  }
  func.func @transform_0(%arg0: i32) -> (i32, i32) {
    %c0_i32 = arith.constant 0 : i32
    %c0_i32_0 = arith.constant 0 : i32
    %c0_i32_1 = arith.constant 0 : i32
    return %c0_i32, %c0_i32_0 : i32, i32
  }
  func.func @transform_1(%arg0: i32) -> (i32, i32) {
    %c0_i32 = arith.constant 0 : i32
    %c0_i32_0 = arith.constant 0 : i32
    return %c0_i32, %arg0 : i32, i32
  }
  func.func @transform_2(%arg0: i32) -> (i32, i32) {
    %c0_i32 = arith.constant 0 : i32
    %c0_i32_0 = arith.constant 0 : i32
    %c0_i32_1 = arith.constant 0 : i32
    return %c0_i32, %c0_i32_0 : i32, i32
  }
  func.func @transform_3(%arg0: i32) -> (i32, i32) {
    %c0_i32 = arith.constant 0 : i32
    %c0_i32_0 = arith.constant 0 : i32
    %c0_i32_1 = arith.constant 0 : i32
    return %c0_i32, %c0_i32_0 : i32, i32
  }
  func.func @transform_4(%arg0: i32) -> (i32, i32) {
    %c0_i32 = arith.constant 0 : i32
    %c0_i32_0 = arith.constant 0 : i32
    %c0_i32_1 = arith.constant 0 : i32
    return %c0_i32, %c0_i32_0 : i32, i32
  }
  func.func @transform_5(%arg0: i32) -> (i32, i32) {
    %c0_i32 = arith.constant 0 : i32
    %c0_i32_0 = arith.constant 0 : i32
    %c0_i32_1 = arith.constant 0 : i32
    return %c0_i32, %c0_i32_0 : i32, i32
  }
  func.func @transform_6(%arg0: i32) -> (i32, i32, i32) {
    %c0_i32 = arith.constant 0 : i32
    %c0_i32_0 = arith.constant 0 : i32
    %c0_i32_1 = arith.constant 0 : i32
    return %arg0, %c0_i32, %c0_i32_0 : i32, i32, i32
  }
}

</mosaic_0001>

<bundles_post_ra>
// kernel: composite_model_forward.1
= control target key start
LH: loop header
LB: loop body
LE: loop exit
PB: predicated region body
PF: predicated region fallthrough
CT: control target
= control target key end

     0   :  { %11 = vsyncpa [#allocation4], 0  ;;  %s4025_s0 = inlined_call_operand.vmem [shape: f32[9,1024], index: 0, kind: input, shape index: {}]   ;;  %s4026_s1 = inlined_call_operand.vmem [shape: f32[4,2048], index: 1, kind: input, shape index: {}]   ;;  %s4027_s2 = inlined_call_operand.vmem [shape: bf16[16,72], index: 2, kind: input, shape index: {}]   ;;  %s4028_s3 = inlined_call_operand.vmem [shape: f32[16,1], index: 3, kind: input, shape index: {}]   ;;  %s4029_s4 = inlined_call_operand.vmem [shape: f32[16,128], index: 4, kind: input, shape index: {}]   ;;  %s4030_s5 = inlined_call_operand.vmem [shape: f32[1,128], index: 5, kind: input, shape index: {}]   ;;  %s4031_s6 = inlined_call_operand.hbm [shape: f32[2,4,128], index: 6, kind: output, shape index: {}]  }
   0x1   :  { %13 = vsyncpa [#allocation4 + $0x1], 0  ;;  %s2369_s21 = smov 0   ;;  %s2371_s22 = smov 0  }
   0x2   :  { %s2373_s23 = smov 0   ;;  %s2375_s24 = smov 0  }
   0x3 LB: > { %s2390_s25 = sadd.s32 4294967295, %s2322_s24   ;;  %s2149_s26 = sadd.s32 4294967294, %s2322_s24   ;;  %s2322_s24 = sphi %s2375_s24, %s4203_s24   ;;  %s2318_s23 = sphi %s2373_s23, %s4202_s23   ;;  %s2314_s22 = sphi %s2371_s22, %s4201_s22   ;;  %s2310_s21 = sphi %s2369_s21, %s4200_s21  }
   0x4   : > { %s2394_s27 = sadd.s32 1, %s2322_s24   ;;  %s157_s28 = sadd.s32 1, %s2318_s23 }
   0x5   : > { %s154_s29 = ssub.s32 %s2322_s24, %s2394_s27  ;;  %p167_p0 = scmp.ne.s32.totalorder %s2318_s23, %s2314_s22 }
   0x6   : > { %p155_p1 = scmp.eq.s32.totalorder %s154_s29, 0  ;;  %p168_p2 = scmp.eq.s32.totalorder %s2390_s25, 1 }
   0x7   : > { %p173_p3 = scmp.ne.s32.totalorder %s2314_s22, %s2310_s21  ;;  %p174_p4 = scmp.eq.s32.totalorder %s2149_s26, 1 }
   0x8   : > { %s2405_s30 = scalar_select %p155_p1, %s2318_s23, %s157_s28  }
   0x9   : > { %p2407_p5 = por %p168_p2, %p167_p0  ;;  %p2411_p6 = por %p174_p4, %p173_p3 }
   0xa   : > { %p2152_p7 = scmp.ge.s32.totalorder %s2322_s24, 1  ;;  %p216_p8 = scmp.lt.s32.totalorder %s2322_s24, 3 }
   0xc   : > { %p217_p9 = pnand %p2152_p7, %p216_p8 }
   0xe   : > { %220 = sbr.rel (%p217_p9) target bundleno = 943 (0x3af), region = 44 }
  0x13   : > { %s2154_s9 = sshll.u32 %s2390_s25, 3  ;;  %s2324_s14 = smov 17   ;;  %vm1105_vm8 = vcmask 1043456  }
  0x14   : > { %p247_p10 = scmp.lt.s32.totalorder %s2154_s9, 15  ;;  %s2325_s15 = smov 16  }
  0x15   : > { %s2326_s16 = smov 15   ;;  %s2327_s17 = smov 1  }
  0x16   : > { %s4205_s9 = smov (!%p247_p10, %s2154_s9), 15  ;;  %s2328_s18 = smov 127  }
  0x17   : > { %s2155_s10 = sshll.u32 %s4205_s9, 2  ;;  %s2329_s19 = smov 113  }
  0x18   : > { %s250_s13 = scalar_lea.vmem %s4026_s1, %s2155_s10  ;;  %s2330_s20 = smov 112  }
  0x19   : > { %v2421_v0 = vld [vmem:[%s250_s13 + $0x10] sm:$0xff]  ;;  %v2423_v1 = vld [vmem:[%s250_s13 + $0x8] sm:$0xff]  ;;  %v2425_v2 = vld [vmem:[%s250_s13] sm:$0xff]  ;;  %s2331_s26 = smov 111   ;;  %s2280_s10 = scalar_lea.hbm %s4031_s6, 8 }
  0x1a   : > { %4089 = vst [vmem:[#allocation6_spill] sm:$0xff] %v2421_v0  ;;  %v2428_v3 = vld [vmem:[%s250_s13 + $0x18] sm:$0xff]  ;;  %v664_v32 = vmul.f32 %v2421_v0, %v2421_v0  ;;  %v663_v35 = vmul.f32 %v2423_v1, %v2423_v1  ;;  %v662_v57 = vmul.f32 %v2425_v2, %v2425_v2 }
  0x1b   : > { %4090 = vst [vmem:[#allocation7_spill] sm:$0xff] %v2423_v1  ;;  %v665_v40 = vmul.f32 %v2428_v3, %v2428_v3 }
  0x1c   : > { %4091 = vst [vmem:[#allocation8_spill] sm:$0xff] %v2425_v2 }
  0x1d   : > { %281 = vst [vmem:[#allocation1 + $0x20] ss:$2 sm:$0xff] %v2421_v0 }
  0x1e   : > { %4092 = vst [vmem:[#allocation9_spill] sm:$0xff] %v2428_v3 }
  0x1f   : > { %279 = vst [vmem:[#allocation1 + $0x10] ss:$2 sm:$0xff] %v2423_v1 }
  0x20   : > { %277 = vst [vmem:[#allocation1] ss:$2 sm:$0xff] %v2425_v2 }
  0x21   : > { %283 = vst [vmem:[#allocation1 + $0x30] ss:$2 sm:$0xff] %v2428_v3 }
  0x24   : > { %v288_v4 = vld.sshfl [vmem:[#allocation1 + $0x20] sm:$0xff pattern:$0x75316420]  ;;  %v289_v5 = vld.sshfl [vmem:[#allocation1 + $0x28] sm:$0xff pattern:$0x75316420] }
  0x25   : > { %308 = vrot.lane.b32.xlu2 %v288_v4, %s2324_s14  ;;  %371 = vst [vmem:[#allocation1 + $0x20] ss:$2 sm:$0xff] %v2421_v0 }
  0x26   : > { %v286_v6 = vld.sshfl [vmem:[#allocation1 + $0x10] sm:$0xff pattern:$0x75316420]  ;;  %v287_v8 = vld.sshfl [vmem:[#allocation1 + $0x18] sm:$0xff pattern:$0x75316420] }
  0x27   : > { %304 = vrot.lane.b32.xlu1 %v286_v6, %s2324_s14  ;;  %v284_v7 = vld.sshfl [vmem:[#allocation1] sm:$0xff pattern:$0x75316420]  ;;  %369 = vst [vmem:[#allocation1 + $0x10] ss:$2 sm:$0xff] %v2423_v1 }
  0x28   : > { %300 = vrot.lane.b32.xlu0 %v284_v7, %s2324_s14  ;;  %v285_v9 = vld.sshfl [vmem:[#allocation1 + $0x8] sm:$0xff pattern:$0x75316420]  ;;  %v290_v10 = vld.sshfl [vmem:[#allocation1 + $0x30] sm:$0xff pattern:$0x75316420] }
  0x29   : > { %367 = vst [vmem:[#allocation1] ss:$2 sm:$0xff] %v2425_v2  ;;  %v2439_v11 = vld.sshfl [vmem:[#allocation1 + $0x38] sm:$0xff pattern:$0x75316420] }
  0x2a   : > { %373 = vst [vmem:[#allocation1 + $0x30] ss:$2 sm:$0xff] %v2428_v3 }
  0x2c   : > { %v379_v12 = vld.sshfl [vmem:[#allocation1 + $0x28] sm:$0xff pattern:$0x75316420]  ;;  %v378_v13 = vld.sshfl [vmem:[#allocation1 + $0x20] sm:$0xff pattern:$0x75316420] }
  0x2d   : > { %310 = vrot.lane.b32.xlu2 %v289_v5, %s2324_s14  ;;  %459 = vst [vmem:[#allocation1 + $0x20] ss:$2 sm:$0xff] %v2421_v0 }
  0x2e   : > { %v377_v14 = vld.sshfl [vmem:[#allocation1 + $0x18] sm:$0xff pattern:$0x75316420]  ;;  %v376_v15 = vld.sshfl [vmem:[#allocation1 + $0x10] sm:$0xff pattern:$0x75316420] }
  0x2f   : > { %306 = vrot.lane.b32.xlu1 %v287_v8, %s2324_s14  ;;  %457 = vst [vmem:[#allocation1 + $0x10] ss:$2 sm:$0xff] %v2423_v1 }
  0x30   : > { %302 = vrot.lane.b32.xlu0 %v285_v9, %s2324_s14  ;;  %v375_v16 = vld.sshfl [vmem:[#allocation1 + $0x8] sm:$0xff pattern:$0x75316420]  ;;  %v2447_v17 = vld.sshfl [vmem:[#allocation1] sm:$0xff pattern:$0x75316420] }
  0x31   : > { %455 = vst [vmem:[#allocation1] ss:$2 sm:$0xff] %v2425_v2  ;;  %v2450_v18 = vld.sshfl [vmem:[#allocation1 + $0x30] sm:$0xff pattern:$0x75316420] }
  0x32   : > { %v2452_v19 = vld.sshfl [vmem:[#allocation1 + $0x38] sm:$0xff pattern:$0x75316420] }
  0x33   : > { %461 = vst [vmem:[#allocation1 + $0x30] ss:$2 sm:$0xff] %v2428_v3 }
  0x34   : > { %v466_v20 = vld.sshfl [vmem:[#allocation1 + $0x20] sm:$0xff pattern:$0x75316420]  ;;  %v467_v21 = vld.sshfl [vmem:[#allocation1 + $0x28] sm:$0xff pattern:$0x75316420] }
  0x35   : > { %396 = vrot.lane.b32.xlu2 %v377_v14, %s2325_s15  ;;  %547 = vst [vmem:[#allocation1 + $0x20] ss:$2 sm:$0xff] %v2421_v0  ;;  %v316_v14 = vlaneseq }
  0x36   : > { %v465_v22 = vld.sshfl [vmem:[#allocation1 + $0x18] sm:$0xff pattern:$0x75316420]  ;;  %v464_v23 = vld.sshfl [vmem:[#allocation1 + $0x10] sm:$0xff pattern:$0x75316420] }
  0x37   : > { %394 = vrot.lane.b32.xlu1 %v376_v15, %s2325_s15  ;;  %545 = vst [vmem:[#allocation1 + $0x10] ss:$2 sm:$0xff] %v2423_v1 }
  0x38   : > { %312 = vrot.lane.b32.xlu0 %v290_v10, %s2324_s14  ;;  %v463_v24 = vld.sshfl [vmem:[#allocation1 + $0x8] sm:$0xff pattern:$0x75316420]  ;;  %v2460_v25 = vld.sshfl [vmem:[#allocation1] sm:$0xff pattern:$0x75316420] }
  0x39   : > { %543 = vst [vmem:[#allocation1] ss:$2 sm:$0xff] %v2425_v2 }
  0x3a   : > { %v2463_v26 = vld.sshfl [vmem:[#allocation1 + $0x30] sm:$0xff pattern:$0x75316420]  ;;  %v2465_v27 = vld.sshfl [vmem:[#allocation1 + $0x38] sm:$0xff pattern:$0x75316420] }
  0x3b   : > { %549 = vst [vmem:[#allocation1 + $0x30] ss:$2 sm:$0xff] %v2428_v3 }
  0x3c   : > { %v555_v28 = vld.sshfl [vmem:[#allocation1 + $0x28] sm:$0xff pattern:$0x75316420]  ;;  %v554_v29 = vld.sshfl [vmem:[#allocation1 + $0x20] sm:$0xff pattern:$0x75316420] }
  0x3d   : > { %392 = vrot.lane.b32.xlu2 %v375_v16, %s2325_s15  ;;  %635 = vst [vmem:[#allocation1 + $0x20] ss:$2 sm:$0xff] %v2421_v0 }
  0x3e   : > { %v552_v30 = vld.sshfl [vmem:[#allocation1 + $0x10] sm:$0xff pattern:$0x75316420]  ;;  %v553_v31 = vld.sshfl [vmem:[#allocation1 + $0x18] sm:$0xff pattern:$0x75316420] }
  0x3f   : > { %400 = vrot.lane.b32.xlu1 %v379_v12, %s2325_s15  ;;  %633 = vst [vmem:[#allocation1 + $0x10] ss:$2 sm:$0xff] %v2423_v1 }
  0x40   : > { %398 = vrot.lane.b32.xlu0 %v378_v13, %s2325_s15  ;;  %v551_v51 = vld.sshfl [vmem:[#allocation1 + $0x8] sm:$0xff pattern:$0x75316420]  ;;  %v550_v54 = vld.sshfl [vmem:[#allocation1] sm:$0xff pattern:$0x75316420] }
  0x41   : > { %631 = vst [vmem:[#allocation1] ss:$2 sm:$0xff] %v2425_v2 }
  0x42   : > { %v2475_v33 = vld.sshfl [vmem:[#allocation1 + $0x30] sm:$0xff pattern:$0x75316420]  ;;  %v2477_v34 = vld.sshfl [vmem:[#allocation1 + $0x38] sm:$0xff pattern:$0x75316420] }
  0x43   : > { %637 = vst [vmem:[#allocation1 + $0x30] ss:$2 sm:$0xff] %v2428_v3 }
  0x44   : > { %v2482_v36 = vld.sshfl [vmem:[#allocation1 + $0x20] sm:$0xff pattern:$0x75316420]  ;;  %v2484_v37 = vld.sshfl [vmem:[#allocation1 + $0x28] sm:$0xff pattern:$0x75316420] }
  0x45   : > { %486 = vrot.lane.b32.xlu2 %v466_v20, %s2326_s16  ;;  %674 = vst [vmem:[#allocation1 + $0x20] ss:$2 sm:$0xff] %v664_v32 }
  0x46   : > { %v2488_v38 = vld.sshfl [vmem:[#allocation1 + $0x10] sm:$0xff pattern:$0x75316420]  ;;  %v2490_v39 = vld.sshfl [vmem:[#allocation1 + $0x18] sm:$0xff pattern:$0x75316420] }
  0x47   : > { %484 = vrot.lane.b32.xlu1 %v465_v22, %s2326_s16  ;;  %672 = vst [vmem:[#allocation1 + $0x10] ss:$2 sm:$0xff] %v663_v35 }
  0x48   : > { %482 = vrot.lane.b32.xlu0 %v464_v23, %s2326_s16  ;;  %v2533_v60 = vld.sshfl [vmem:[#allocation1] sm:$0xff pattern:$0x75316420]  ;;  %v2535_v61 = vld.sshfl [vmem:[#allocation1 + $0x8] sm:$0xff pattern:$0x75316420] }
  0x49   : > { %670 = vst [vmem:[#allocation1] ss:$2 sm:$0xff] %v662_v57 }
  0x4a   : > { %v2495_v41 = vld.sshfl [vmem:[#allocation1 + $0x30] sm:$0xff pattern:$0x75316420]  ;;  %v2497_v42 = vld.sshfl [vmem:[#allocation1 + $0x38] sm:$0xff pattern:$0x75316420] }
  0x4b   : > { %4093 = vst [vmem:[#allocation10_spill] sm:$0xff] %v2495_v41 }
  0x4c   : > { %4094 = vst [vmem:[#allocation11_spill] sm:$0xff] %v2497_v42  ;;  %v2499_v43 = vld.sshfl [vmem:[#allocation1 + $0x20] sm:$0xff pattern:$0x75316420] }
  0x4d   : > { %676 = vst [vmem:[#allocation1 + $0x30] ss:$2 sm:$0xff] %v665_v40  ;;  %v2501_v44 = vld.sshfl [vmem:[#allocation1 + $0x28] sm:$0xff pattern:$0x75316420]  ;;  %570 = vrot.lane.b32.xlu2 %v552_v30, %s2327_s17 }
  0x4e   : > { %705 = vst [vmem:[#allocation1 + $0x20] ss:$2 sm:$0xff] %v2421_v0  ;;  %v2506_v45 = vld.sshfl [vmem:[#allocation1 + $0x10] sm:$0xff pattern:$0x75316420] }
  0x4f   : > { %480 = vrot.lane.b32.xlu1 %v463_v24, %s2326_s16  ;;  %v2508_v46 = vld.sshfl [vmem:[#allocation1 + $0x18] sm:$0xff pattern:$0x75316420] }
  0x50   : > { %488 = vrot.lane.b32.xlu0 %v467_v21, %s2326_s16  ;;  %703 = vst [vmem:[#allocation1 + $0x10] ss:$2 sm:$0xff] %v2423_v1  ;;  %v2547_v6 = vld.sshfl [vmem:[#allocation1] sm:$0xff pattern:$0x75316420]  ;;  %v2569_v21 = vand.u32 127, %v316_v14 }
  0x51   : > { %v2549_v7 = vld.sshfl [vmem:[#allocation1 + $0x8] sm:$0xff pattern:$0x75316420] }
  0x52   : > { %701 = vst [vmem:[#allocation1] ss:$2 sm:$0xff] %v2425_v2  ;;  %vm318_vm0 = vcmp.lt.s32.totalorder %v2569_v21, 17  ;;  %vm4086_vm1 = vcmp.lt.s32.totalorder %v2569_v21, 16  ;;  %v2649_v14 = vld [vmem:[%s4025_s0 + $0x28] sm:$0xff]  ;;  %vm494_vm2 = vcmp.lt.s32.totalorder %v2569_v21, 15 }
  0x53   : > { %vm582_vm3 = vcmp.lt.s32.totalorder %v2569_v21, 1  ;;  %vm740_vm4 = vcmp.lt.s32.totalorder %v2569_v21, 127  ;;  %vm828_vm5 = vcmp.lt.s32.totalorder %v2569_v21, 113  ;;  %vm916_vm6 = vcmp.lt.s32.totalorder %v2569_v21, 112 }
  0x54   : > { %v2512_v47 = vld.sshfl [vmem:[#allocation1 + $0x30] sm:$0xff pattern:$0x75316420]  ;;  %v2514_v48 = vld.sshfl [vmem:[#allocation1 + $0x38] sm:$0xff pattern:$0x75316420] }
  0x55   : > { %4095 = vst [vmem:[#allocation12_spill] sm:$0xff] %v2512_v47  ;;  %v712_v49 = vld.sshfl [vmem:[#allocation1 + $0x20] sm:$0xff pattern:$0x75316420]  ;;  %576 = vrot.lane.b32.xlu2 %v555_v28, %s2327_s17  ;;  %vm1004_vm7 = vcmp.lt.s32.totalorder %v2569_v21, 111 }
  0x56   : > { %4096 = vst [vmem:[#allocation13_spill] sm:$0xff] %v2514_v48  ;;  %v713_v50 = vld.sshfl [vmem:[#allocation1 + $0x28] sm:$0xff pattern:$0x75316420] }
  0x57   : > { %707 = vst [vmem:[#allocation1 + $0x30] ss:$2 sm:$0xff] %v2428_v3  ;;  %574 = vrot.lane.b32.xlu1 %v554_v29, %s2327_s17  ;;  %v711_v52 = vld.sshfl [vmem:[#allocation1 + $0x18] sm:$0xff pattern:$0x75316420] }
  0x58   : > { %793 = vst [vmem:[#allocation1 + $0x20] ss:$2 sm:$0xff] %v2421_v0  ;;  %v710_v53 = vld.sshfl [vmem:[#allocation1 + $0x10] sm:$0xff pattern:$0x75316420]  ;;  %572 = vrot.lane.b32.xlu0 %v553_v31, %s2327_s17 }
  0x59   : > { %791 = vst [vmem:[#allocation1 + $0x10] ss:$2 sm:$0xff] %v2423_v1  ;;  %v709_v20 = vld.sshfl [vmem:[#allocation1 + $0x8] sm:$0xff pattern:$0x75316420] }
  0x5d   : > { %314 = vrot.lane.b32.xlu2 %v2439_v11, %s2324_s14 }
  0x5e   : > { %v714_v55 = vld.sshfl [vmem:[#allocation1 + $0x30] sm:$0xff pattern:$0x75316420]  ;;  %v2523_v56 = vld.sshfl [vmem:[#allocation1 + $0x38] sm:$0xff pattern:$0x75316420] }
  0x5f   : > { %795 = vst [vmem:[#allocation1 + $0x30] ss:$2 sm:$0xff] %v2428_v3  ;;  %568 = vrot.lane.b32.xlu1 %v551_v51, %s2327_s17  ;;  %v801_v58 = vld.sshfl [vmem:[#allocation1 + $0x28] sm:$0xff pattern:$0x75316420]  ;;  %v2613_v51 = vld [vmem:[%s4025_s0 + $0x18] sm:$0xff] }
  0x60   : > { %v800_v59 = vld.sshfl [vmem:[#allocation1 + $0x20] sm:$0xff pattern:$0x75316420]  ;;  %390 = vrot.lane.b32.xlu0 %v2447_v17, %s2325_s15  ;;  %v798_v62 = vld.sshfl [vmem:[#allocation1 + $0x10] sm:$0xff pattern:$0x75316420] }
  0x61   : > { %v799_v63 = vld.sshfl [vmem:[#allocation1 + $0x18] sm:$0xff pattern:$0x75316420]  ;;  %881 = vst [vmem:[#allocation1 + $0x20] ss:$2 sm:$0xff] %v2421_v0 }
  0x62   : > { %879 = vst [vmem:[#allocation1 + $0x10] ss:$2 sm:$0xff] %v2423_v1  ;;  %v708_v17 = vld.sshfl [vmem:[#allocation1] sm:$0xff pattern:$0x75316420] }
  0x63   : > { %789 = vst [vmem:[#allocation1] ss:$2 sm:$0xff] %v2425_v2 }
  0x65   : > { %730 = vrot.lane.b32.xlu2 %v711_v52, %s2328_s18 }
  0x66   : > { %v802_v4 = vld.sshfl [vmem:[#allocation1 + $0x30] sm:$0xff pattern:$0x75316420]  ;;  %v2540_v5 = vld.sshfl [vmem:[#allocation1 + $0x38] sm:$0xff pattern:$0x75316420] }
  0x67   : > { %478 = vrot.lane.b32.xlu1 %v2460_v25, %s2326_s16  ;;  %883 = vst [vmem:[#allocation1 + $0x30] ss:$2 sm:$0xff] %v2428_v3 }
  0x68   : > { %404 = vrot.lane.b32.xlu0 %v2452_v19, %s2325_s15  ;;  %v889_v8 = vld.sshfl [vmem:[#allocation1 + $0x28] sm:$0xff pattern:$0x75316420]  ;;  %v888_v10 = vld.sshfl [vmem:[#allocation1 + $0x20] sm:$0xff pattern:$0x75316420] }
  0x69   : > { %v887_v9 = vld.sshfl [vmem:[#allocation1 + $0x18] sm:$0xff pattern:$0x75316420]  ;;  %969 = vst [vmem:[#allocation1 + $0x20] ss:$2 sm:$0xff] %v2421_v0 }
  0x6a   : > { %v886_v11 = vld.sshfl [vmem:[#allocation1 + $0x10] sm:$0xff pattern:$0x75316420]  ;;  %v797_v29 = vld.sshfl [vmem:[#allocation1 + $0x8] sm:$0xff pattern:$0x75316420] }
  0x6b   : > { %967 = vst [vmem:[#allocation1 + $0x10] ss:$2 sm:$0xff] %v2423_v1 }
  0x6d   : > { %736 = vrot.lane.b32.xlu2 %v714_v55, %s2328_s18 }
  0x6e   : > { %v890_v12 = vld.sshfl [vmem:[#allocation1 + $0x30] sm:$0xff pattern:$0x75316420]  ;;  %v2558_v13 = vld.sshfl [vmem:[#allocation1 + $0x38] sm:$0xff pattern:$0x75316420] }
  0x6f   : > { %734 = vrot.lane.b32.xlu1 %v713_v50, %s2328_s18  ;;  %971 = vst [vmem:[#allocation1 + $0x30] ss:$2 sm:$0xff] %v2428_v3 }
  0x70   : > { %732 = vrot.lane.b32.xlu0 %v712_v49, %s2328_s18  ;;  %v977_v15 = vld.sshfl [vmem:[#allocation1 + $0x28] sm:$0xff pattern:$0x75316420]  ;;  %v976_v16 = vld.sshfl [vmem:[#allocation1 + $0x20] sm:$0xff pattern:$0x75316420] }
  0x71   : > { %1306 = vst [vmem:[#allocation1 + $0x20] ss:$2 sm:$0xff] %v2421_v0 }
  0x72   : > { %v975_v24 = vld.sshfl [vmem:[#allocation1 + $0x18] sm:$0xff pattern:$0x75316420]  ;;  %v2582_v25 = vld.sshfl [vmem:[#allocation1 + $0x10] sm:$0xff pattern:$0x75316420] }
  0x73   : > { %1304 = vst [vmem:[#allocation1 + $0x10] ss:$2 sm:$0xff] %v2423_v1 }
  0x75   : > { %728 = vrot.lane.b32.xlu2 %v710_v53, %s2328_s18  ;;  %v2618_v53 = vld [vmem:[%s4025_s0 + $0x10] sm:$0xff] }
  0x77   : > { %566 = vrot.lane.b32.xlu1 %v550_v54, %s2327_s17 }
  0x78   : > { %492 = vrot.lane.b32.xlu0 %v2465_v27, %s2326_s16  ;;  %v796_v27 = vld.sshfl [vmem:[#allocation1] sm:$0xff pattern:$0x75316420] }
  0x79   : > { %877 = vst [vmem:[#allocation1] ss:$2 sm:$0xff] %v2425_v2 }
  0x7d   : > { %822 = vrot.lane.b32.xlu2 %v801_v58, %s2329_s19 }
  0x7f   : > { %820 = vrot.lane.b32.xlu1 %v800_v59, %s2329_s19  ;;  %v309_v19 = vpop.permute.xlu2 %308 }
  0x80   : > { %818 = vrot.lane.b32.xlu0 %v799_v63, %s2329_s19  ;;  %v2594_v31 = vld.sshfl [vmem:[#allocation1 + $0x8] sm:$0xff pattern:$0x75316420]  ;;  %v2596_v32 = vld.sshfl [vmem:[#allocation1] sm:$0xff pattern:$0x75316420] }
  0x81   : > { %965 = vst [vmem:[#allocation1] ss:$2 sm:$0xff] %v2425_v2  ;;  %v4033_v63 = vperm.slane %v2618_v53, 0 }
  0x85   : > { %816 = vrot.lane.b32.xlu2 %v798_v62, %s2329_s19  ;;  %v4032_v62 = vperm.slane %v2613_v51, 0 }
  0x87   : > { %580 = vrot.lane.b32.xlu1 %v2477_v34, %s2327_s17  ;;  %v311_v22 = vpop.permute.xlu2 %310 }
  0x88   : > { %824 = vrot.lane.b32.xlu0 %v802_v4, %s2329_s19  ;;  %v2578_v23 = vsel %vm318_vm0, %v309_v19, %v311_v22  ;;  %v2606_v49 = vld.sshfl [vmem:[#allocation1 + $0x8] sm:$0xff pattern:$0x75316420]  ;;  %v2608_v50 = vld.sshfl [vmem:[#allocation1] sm:$0xff pattern:$0x75316420] }
  0x89   : > { %1302 = vst [vmem:[#allocation1] ss:$2 sm:$0xff] %v2425_v2  ;;  %v978_v4 = vld.sshfl [vmem:[#allocation1 + $0x30] sm:$0xff pattern:$0x75316420] }
  0x8d   : > { %910 = vrot.lane.b32.xlu2 %v889_v8, %s2330_s20  ;;  %v4037_v8 = vperm.slane %v2618_v53, 1 }
  0x8f   : > { %908 = vrot.lane.b32.xlu1 %v888_v10, %s2330_s20  ;;  %v2585_v28 = vpop.permute.xlu2 %396 }
  0x90   : > { %906 = vrot.lane.b32.xlu0 %v887_v9, %s2330_s20  ;;  %v4034_v9 = vperm.slane %v2613_v51, 1 }
  0x95   : > { %904 = vrot.lane.b32.xlu2 %v886_v11, %s2330_s20 }
  0x97   : > { %726 = vrot.lane.b32.xlu1 %v709_v20, %s2328_s18  ;;  %v2592_v30 = vpop.permute.xlu2 %392 }
  0x98   : > { %912 = vrot.lane.b32.xlu0 %v890_v12, %s2330_s20 }
  0x99   : > { %v305_v34 = vpop.permute.xlu1 %304 }
  0x9a   : > { %v2599_v35 = vpop.permute.xlu0 %300 }
  0x9d   : > { %998 = vrot.lane.b32.xlu2 %v977_v15, %s2331_s26  ;;  %v2654_v15 = vld [vmem:[%s4025_s0 + $0x20] sm:$0xff] }
  0x9f   : > { %996 = vrot.lane.b32.xlu1 %v976_v16, %s2331_s26  ;;  %v2604_v40 = vpop.permute.xlu2 %486 }
  0xa0   : > { %994 = vrot.lane.b32.xlu0 %v975_v24, %s2331_s26 }
  0xa1   : > { %v307_v52 = vpop.permute.xlu1 %306 }
  0xa2   : > { %v322_v54 = vsel %vm318_vm0, %v307_v52, %v309_v19  ;;  %v323_v55 = vsel %vm318_vm0, %v305_v34, %v307_v52  ;;  %v303_v57 = vpop.permute.xlu0 %302  ;;  %v4035_v52 = vperm.slane %v2649_v14, 0 }
  0xa3   : > { %v324_v58 = vsel %vm318_vm0, %v303_v57, %v305_v34  ;;  %v2630_v59 = vsel %vm318_vm0, %v2599_v35, %v303_v57  ;;  %v338_v10 = vmul.f32 %v4032_v62, %v323_v55  ;;  %v4036_v55 = vperm.slane %v2654_v15, 0 }
  0xa4   : > { %v337_v11 = vmul.f32 %v4033_v63, %v324_v58 }
  0xa5   : > { %814 = vrot.lane.b32.xlu2 %v797_v29, %s2329_s19  ;;  %v354_v57 = vmul.f32 %v338_v10, %v338_v10 }
  0xa6   : > { %v353_v58 = vmul.f32 %v337_v11, %v337_v11 }
  0xa7   : > { %724 = vrot.lane.b32.xlu1 %v708_v17, %s2328_s18  ;;  %v2644_v12 = vpop.permute.xlu2 %570 }
  0xa8   : > { %1000 = vrot.lane.b32.xlu0 %v978_v4, %s2331_s26 }
  0xa9   : > { %v395_v16 = vpop.permute.xlu1 %394 }
  0xaa   : > { %v411_v17 = vsel %vm4086_vm1, %v395_v16, %v2585_v28  ;;  %v412_v19 = vsel %vm4086_vm1, %v2592_v30, %v395_v16  ;;  %v313_v20 = vpop.permute.xlu0 %312 }
  0xab   : > { %v425_v24 = vmul.f32 %v4037_v8, %v412_v19  ;;  %v426_v29 = vmul.f32 %v4034_v9, %v411_v17  ;;  %v2668_v34 = vsel %vm318_vm0, %v311_v22, %v313_v20  ;;  %v2679_v22 = vld.sshfl [vmem:[#allocation1 + $0x38] sm:$0xff pattern:$0x75316420]  ;;  %v4039_v9 = vperm.slane %v2654_v15, 1 }
  0xac   : > { %1308 = vst [vmem:[#allocation1 + $0x30] ss:$2 sm:$0xff] %v2428_v3 }
  0xad   : > { %v2672_v4 = vadd.f32 %v425_v24, %v337_v11  ;;  %v434_v16 = vadd.f32 %v426_v29, %v338_v10  ;;  %v441_v62 = vmul.f32 %v425_v24, %v425_v24  ;;  %v442_v63 = vmul.f32 %v426_v29, %v426_v29  ;;  %812 = vrot.lane.b32.xlu2 %v796_v27, %s2329_s19 }
  0xae   : > { %v4038_v11 = vperm.slane %v2649_v14, 1  ;;  %v340_v27 = vmul.f32 %v4035_v52, %v2578_v23 }
  0xaf   : > { %v2675_v19 = vadd.f32 %v441_v62, %v353_v58  ;;  %v450_v17 = vadd.f32 %v442_v63, %v354_v57  ;;  %992 = vrot.lane.b32.xlu1 %v2582_v25, %s2331_s26  ;;  %v2685_v10 = vpop.permute.xlu2 %576  ;;  %v339_v25 = vmul.f32 %v4036_v55, %v322_v54 }
  0xb0   : > { %402 = vrot.lane.b32.xlu0 %v2450_v18, %s2325_s15  ;;  %4097 = vst [vmem:[#allocation14_spill] sm:$0xff] %v2685_v10  ;;  %v356_v57 = vmul.f32 %v340_v27, %v340_v27 }
  0xb1   : > { %v2693_v62 = vpop.permute.xlu1 %400  ;;  %v355_v58 = vmul.f32 %v339_v25, %v339_v25 }
  0xb2   : > { %v399_v63 = vpop.permute.xlu0 %398 }
  0xb3   : > { %v409_v18 = vsel %vm4086_vm1, %v399_v63, %v2693_v62  ;;  %v410_v24 = vsel %vm4086_vm1, %v2585_v28, %v399_v63  ;;  %v4041_v28 = vperm.slane %v2654_v15, 2 }
  0xb4   : > { %v427_v29 = vmul.f32 %v4039_v9, %v410_v24  ;;  %v428_v23 = vmul.f32 %v4038_v11, %v409_v18 }
  0xb5   : > { %900 = vrot.lane.b32.xlu2 %v2596_v32, %s2330_s20 }
  0xb6   : > { %v435_v54 = vadd.f32 %v427_v29, %v339_v25  ;;  %v436_v52 = vadd.f32 %v428_v23, %v340_v27  ;;  %v443_v55 = vmul.f32 %v427_v29, %v427_v29  ;;  %v444_v8 = vmul.f32 %v428_v23, %v428_v23 }
  0xb7   : > { %490 = vrot.lane.b32.xlu1 %v2463_v26, %s2326_s16  ;;  %v4043_v25 = vperm.slane %v2613_v51, 2  ;;  %v315_v27 = vpop.permute.xlu2 %314 }
  0xb8   : > { %v451_v63 = vadd.f32 %v443_v55, %v355_v58  ;;  %v452_v24 = vadd.f32 %v444_v8, %v356_v57  ;;  %902 = vrot.lane.b32.xlu0 %v2594_v31, %s2330_s20  ;;  %v2716_v29 = vsel %vm318_vm0, %v313_v20, %v315_v27  ;;  %v2721_v26 = vsel %vm318_vm0, %v315_v27, %v2599_v35 }
  0xb9   : > { %v485_v18 = vpop.permute.xlu1 %484  ;;  %v4042_v27 = vperm.slane %v2618_v53, 2 }
  0xba   : > { %v498_v32 = vsel %vm494_vm2, %v485_v18, %v2604_v40  ;;  %v483_v8 = vpop.permute.xlu0 %482 }
  0xbb   : > { %v515_v31 = vmul.f32 %v4041_v28, %v498_v32  ;;  %v499_v55 = vsel %vm494_vm2, %v483_v8, %v485_v18  ;;  %v4040_v18 = vperm.slane %v2649_v14, 2 }
  0xbc   : > { %v514_v20 = vmul.f32 %v4043_v25, %v499_v55 }
  0xbd   : > { %v523_v23 = vadd.f32 %v515_v31, %v435_v54  ;;  %v531_v57 = vmul.f32 %v515_v31, %v515_v31  ;;  %988 = vrot.lane.b32.xlu2 %v2608_v50, %s2331_s26 }
  0xbe   : > { %v522_v58 = vadd.f32 %v514_v20, %v434_v16  ;;  %v530_v11 = vmul.f32 %v514_v20, %v514_v20 }
  0xbf   : > { %v539_v35 = vadd.f32 %v531_v57, %v451_v63  ;;  %578 = vrot.lane.b32.xlu1 %v2475_v33, %s2327_s17  ;;  %v2740_v55 = vpop.permute.xlu2 %730 }
  0xc0   : > { %v538_v32 = vadd.f32 %v530_v11, %v450_v17  ;;  %990 = vrot.lane.b32.xlu0 %v2606_v49, %s2331_s26 }
  0xc1   : > { %v2742_v54 = vpop.permute.xlu1 %480 }
  0xc2   : > { %v2744_v16 = vpop.permute.xlu0 %488  ;;  %v500_v50 = vsel %vm494_vm2, %v2742_v54, %v483_v8 }
  0xc3   : > { %4098 = vst [vmem:[#allocation15_spill] sm:$0xff] %v2744_v16  ;;  %v497_v33 = vsel %vm494_vm2, %v2604_v40, %v2744_v16  ;;  %v513_v49 = vmul.f32 %v4042_v27, %v500_v50  ;;  %v4044_v40 = vperm.slane %v2649_v14, 3  ;;  %v4045_v50 = vperm.slane %v2654_v15, 3 }
  0xc4   : > { %v516_v17 = vmul.f32 %v4040_v18, %v497_v33 }
  0xc5   : > { %v521_v11 = vadd.f32 %v513_v49, %v2672_v4  ;;  %v529_v63 = vmul.f32 %v513_v49, %v513_v49  ;;  %914 = vrot.lane.b32.xlu2 %v2558_v13, %s2330_s20  ;;  %v4047_v4 = vperm.slane %v2613_v51, 3 }
  0xc6   : > { %v524_v31 = vadd.f32 %v516_v17, %v436_v52  ;;  %v532_v20 = vmul.f32 %v516_v17, %v516_v17 }
  0xc7   : > { %v537_v8 = vadd.f32 %v529_v63, %v2675_v19  ;;  %826 = vrot.lane.b32.xlu1 %v2540_v5, %s2329_s19  ;;  %v2768_v52 = vpop.permute.xlu2 %736  ;;  %v2774_v19 = vld [vmem:[%s4025_s0 + $0x8] sm:$0xff] }
  0xc8   : > { %v540_v57 = vadd.f32 %v532_v20, %v452_v24  ;;  %738 = vrot.lane.b32.xlu0 %v2523_v56, %s2328_s18  ;;  %4099 = vst [vmem:[#allocation16_spill] sm:$0xff] %v2768_v52  ;;  %v4046_v20 = vperm.slane %v2774_v19, 0  ;;  %v4057_v47 = vperm.slane %v2774_v19, 3 }
  0xc9   : > { %v575_v13 = vpop.permute.xlu1 %574 }
  0xca   : > { %v573_v5 = vpop.permute.xlu0 %572  ;;  %v585_v24 = vsel %vm582_vm3, %v575_v13, %v2685_v10  ;;  %v4102_v10 = vperm.slane %v2618_v53, 5 }
  0xcb   : > { %v587_v56 = vsel %vm582_vm3, %v2644_v12, %v573_v5  ;;  %v586_v33 = vsel %vm582_vm3, %v573_v5, %v575_v13  ;;  %v604_v49 = vmul.f32 %v4044_v40, %v585_v24  ;;  %v4048_v24 = vperm.slane %v2618_v53, 3 }
  0xcc   : > { %v602_v17 = vmul.f32 %v4047_v4, %v587_v56  ;;  %v603_v63 = vmul.f32 %v4045_v50, %v586_v33 }
  0xcd   : > { %v2791_v9 = vadd.f32 %v604_v49, %v524_v31  ;;  %v620_v18 = vmul.f32 %v604_v49, %v604_v49 }
  0xce   : > { %v2793_v28 = vadd.f32 %v602_v17, %v522_v58  ;;  %v618_v27 = vmul.f32 %v602_v17, %v602_v17  ;;  %v2795_v25 = vadd.f32 %v603_v63, %v523_v23  ;;  %v619_v13 = vmul.f32 %v603_v63, %v603_v63 }
  0xcf   : > { %v2797_v5 = vadd.f32 %v620_v18, %v540_v57  ;;  %v2806_v31 = vpop.permute.xlu2 %728  ;;  %v4049_v58 = vperm.slane %v2774_v19, 1  ;;  %v336_v23 = vmul.f32 %v4046_v20, %v2630_v59  ;;  %v4053_v20 = vperm.slane %v2774_v19, 2 }
  0xd0   : > { %v2800_v40 = vadd.f32 %v618_v27, %v538_v32  ;;  %v2802_v56 = vadd.f32 %v619_v13, %v539_v35  ;;  %1002 = vrot.lane.b32.xlu0 %v2679_v22, %s2331_s26  ;;  %v2818_v35 = vld [vmem:[%s4025_s0] sm:$0xff] }
  0xd1   : > { %v569_v33 = vpop.permute.xlu1 %568  ;;  %v352_v17 = vmul.f32 %v336_v23, %v336_v23 }
  0xd2   : > { %v391_v18 = vpop.permute.xlu0 %390  ;;  %v588_v27 = vsel %vm582_vm3, %v569_v33, %v2644_v12  ;;  %v4050_v12 = vperm.slane %v2818_v35, 0 }
  0xd3   : > { %v413_v22 = vsel %vm4086_vm1, %v391_v18, %v2592_v30  ;;  %v601_v32 = vmul.f32 %v4048_v24, %v588_v27  ;;  %v4054_v27 = vperm.slane %v2818_v35, 1 }
  0xd4   : > { %v424_v59 = vmul.f32 %v4049_v58, %v413_v22 }
  0xd5   : > { %v2827_v57 = vadd.f32 %v601_v32, %v521_v11  ;;  %v617_v49 = vmul.f32 %v601_v32, %v601_v32  ;;  %v335_v11 = vmul.f32 %v4050_v12, %v2721_v26 }
  0xd6   : > { %v432_v63 = vadd.f32 %v424_v59, %v336_v23  ;;  %v440_v13 = vmul.f32 %v424_v59, %v424_v59 }
  0xd7   : > { %v2830_v50 = vadd.f32 %v617_v49, %v537_v8  ;;  %v2833_v30 = vpop.permute.xlu2 %822 }
  0xd8   : > { %v448_v4 = vadd.f32 %v440_v13, %v352_v17  ;;  %v351_v13 = vmul.f32 %v335_v11, %v335_v11 }
  0xd9   : > { %v479_v24 = vpop.permute.xlu1 %478 }
  0xda   : > { %v2839_v22 = vpop.permute.xlu0 %404  ;;  %v501_v23 = vsel %vm494_vm2, %v479_v24, %v2742_v54 }
  0xdb   : > { %v414_v8 = vsel %vm4086_vm1, %v2839_v22, %v391_v18  ;;  %v512_v32 = vmul.f32 %v4053_v20, %v501_v23  ;;  %v4058_v23 = vperm.slane %v2818_v35, 2 }
  0xdc   : > { %v423_v59 = vmul.f32 %v4054_v27, %v414_v8 }
  0xdd   : > { %v520_v49 = vadd.f32 %v512_v32, %v432_v63  ;;  %v528_v17 = vmul.f32 %v512_v32, %v512_v32 }
  0xde   : > { %v431_v26 = vadd.f32 %v423_v59, %v335_v11  ;;  %v439_v58 = vmul.f32 %v423_v59, %v423_v59 }
  0xdf   : > { %v536_v12 = vadd.f32 %v528_v17, %v448_v4  ;;  %v2851_v2 = vpop.permute.xlu2 %816 }
  0xe0   : > { %v447_v3 = vadd.f32 %v439_v58, %v351_v13 }
  0xe1   : > { %v735_v54 = vpop.permute.xlu1 %734 }
  0xe2   : > { %v733_v48 = vpop.permute.xlu0 %732 }
  0xe7   : > { %v2854_v18 = vpop.permute.xlu2 %910 }
  0xe9   : > { %v567_v20 = vpop.permute.xlu1 %566 }
  0xea   : > { %v2857_v42 = vpop.permute.xlu0 %492  ;;  %v589_v63 = vsel %vm582_vm3, %v567_v20, %v569_v33 }
  0xeb   : > { %4100 = vst [vmem:[#allocation17_spill] sm:$0xff] %v2857_v42  ;;  %v502_v4 = vsel %vm494_vm2, %v2857_v42, %v479_v24  ;;  %v600_v58 = vmul.f32 %v4057_v47, %v589_v63  ;;  %v2877_v24 = vld [vmem:[%s4025_s0 + $0x30] sm:$0xff] }
  0xec   : > { %v511_v11 = vmul.f32 %v4058_v23, %v502_v4 }
  0xed   : > { %v2868_v8 = vadd.f32 %v600_v58, %v520_v49  ;;  %v616_v32 = vmul.f32 %v600_v58, %v600_v58  ;;  %v2882_v49 = vld [vmem:[%s4025_s0 + $0x38] sm:$0xff] }
  0xee   : > { %v519_v59 = vadd.f32 %v511_v11, %v431_v26  ;;  %v527_v17 = vmul.f32 %v511_v11, %v511_v11  ;;  %v4065_v26 = vperm.slane %v2882_v49, 0  ;;  %v745_v11 = vsel %vm740_vm4, %v2806_v31, %v2740_v55 }
  0xef   : > { %v2870_v13 = vadd.f32 %v616_v32, %v536_v12  ;;  %v2872_v41 = vpop.permute.xlu2 %904  ;;  %v4066_v12 = vperm.slane %v2818_v35, 3  ;;  %v759_v16 = vmul.f32 %v4102_v10, %v745_v11  ;;  %v695_v11 = vadd.f32 %v2506_v45, %v2830_v50 }
  0xf0   : > { %v535_v27 = vadd.f32 %v527_v17, %v447_v3  ;;  %v4064_v3 = vperm.slane %v2877_v24, 0  ;;  %v2912_v4 = vmul.f32 %v4065_v26, %v2716_v29  ;;  %v742_v29 = vsel %vm740_vm4, %v735_v54, %v2768_v52 }
  0xf1   : > { %v821_v33 = vpop.permute.xlu1 %820  ;;  %v775_v10 = vmul.f32 %v759_v16, %v759_v16  ;;  %v4068_v45 = vperm.slane %v2618_v53, 6  ;;  %v697_v50 = vadd.f32 %v2499_v43, %v2802_v56  ;;  %v4108_v52 = vperm.slane %v2654_v15, 7 }
  0xf2   : > { %v819_v1 = vpop.permute.xlu0 %818  ;;  %v2907_v23 = vmul.f32 %v4064_v3, %v2668_v34  ;;  %v2926_v34 = vmul.f32 %v2912_v4, %v2912_v4  ;;  %v4067_v3 = vperm.slane %v2654_v15, 6 }
  0xf4   : > { %4103 = vst [vmem:[#allocation19_spill] sm:$0xff] %v2926_v34 }
  0xf7   : > { %v2888_v63 = vpop.permute.xlu2 %998 }
  0xf9   : > { %v2891_v58 = vpop.permute.xlu1 %580 }
  0xfa   : > { %4101 = vst [vmem:[#allocation18_spill] sm:$0xff] %v2891_v58  ;;  %v2897_v32 = vpop.permute.xlu0 %824  ;;  %v590_v17 = vsel %vm582_vm3, %v2891_v58, %v567_v20 }
  0xfb   : > { %v599_v47 = vmul.f32 %v4066_v12, %v590_v17  ;;  %v2922_v17 = vmul.f32 %v2907_v23, %v2907_v23  ;;  %v744_v12 = vsel %vm740_vm4, %v2740_v55, %v733_v48  ;;  %v696_v55 = vadd.f32 %v2508_v46, %v2800_v40 }
  0xfc   : > { %v831_v46 = vsel %vm828_vm5, %v821_v33, %v2833_v30 }
  0xfd   : > { %v2916_v42 = vadd.f32 %v599_v47, %v519_v59  ;;  %v615_v0 = vmul.f32 %v599_v47, %v599_v47  ;;  %v659_v47 = vadd.f32 %v2484_v37, %v2791_v9  ;;  %v656_v59 = vadd.f32 %v2488_v38, %v2827_v57 }
  0xfe   : > { %v657_v9 = vadd.f32 %v2490_v39, %v2793_v28  ;;  %v698_v38 = vadd.f32 %v2501_v44, %v2797_v5  ;;  %v743_v57 = vsel %vm740_vm4, %v733_v48, %v735_v54  ;;  %v4104_v39 = vperm.slane %v2613_v51, 5 }
  0xff   : > { %v2918_v20 = vadd.f32 %v615_v0, %v535_v27  ;;  %v2930_v26 = vpop.permute.xlu2 %814  ;;  %v658_v0 = vadd.f32 %v2482_v36, %v2795_v25  ;;  %v4105_v36 = vperm.slane %v2649_v14, 5  ;;  %v767_v40 = vadd.f32 %v759_v16, %v656_v59 }
 0x100   : > { %v760_v28 = vmul.f32 %v4104_v39, %v744_v12  ;;  %v783_v5 = vadd.f32 %v775_v10, %v695_v11  ;;  %v4106_v48 = vperm.slane %v2654_v15, 5  ;;  %v833_v54 = vsel %vm828_vm5, %v2851_v2, %v819_v1 }
 0x101   : > { %v909_v27 = vpop.permute.xlu1 %908  ;;  %v762_v25 = vmul.f32 %v4105_v36, %v742_v29  ;;  %v832_v12 = vsel %vm828_vm5, %v819_v1, %v821_v33  ;;  %v4071_v29 = vperm.slane %v2774_v19, 5  ;;  %v849_v16 = vmul.f32 %v4067_v3, %v831_v46 }
 0x102   : > { %v2946_v37 = vpop.permute.xlu0 %906  ;;  %v761_v56 = vmul.f32 %v4106_v48, %v743_v57  ;;  %v776_v57 = vmul.f32 %v760_v28, %v760_v28  ;;  %v847_v1 = vmul.f32 %v4068_v45, %v833_v54  ;;  %v4107_v33 = vperm.slane %v2613_v51, 6 }
 0x103   : > { %v770_v36 = vadd.f32 %v762_v25, %v659_v47  ;;  %v778_v48 = vmul.f32 %v762_v25, %v762_v25  ;;  %v919_v3 = vsel %vm916_vm6, %v909_v27, %v2854_v18  ;;  %v920_v43 = vsel %vm916_vm6, %v2946_v37, %v909_v27 }
 0x104   : > { %v848_v46 = vmul.f32 %v4107_v33, %v832_v12  ;;  %v777_v25 = vmul.f32 %v761_v56, %v761_v56  ;;  %v655_v54 = vadd.f32 %v2535_v61, %v2868_v8  ;;  %v768_v33 = vadd.f32 %v760_v28, %v657_v9 }
 0x105   : > { %v769_v45 = vadd.f32 %v761_v56, %v658_v0  ;;  %v865_v59 = vmul.f32 %v849_v16, %v849_v16  ;;  %v694_v11 = vadd.f32 %v2549_v7, %v2870_v13  ;;  %v937_v27 = vmul.f32 %v4108_v52, %v919_v3 }
 0x106   : > { %v786_v8 = vadd.f32 %v778_v48, %v698_v38  ;;  %v863_v34 = vmul.f32 %v847_v1, %v847_v1  ;;  %v4109_v0 = vperm.slane %v2613_v51, 7  ;;  %v784_v28 = vadd.f32 %v776_v57, %v696_v55  ;;  %v3035_v55 = vld [vmem:[%s4025_s0 + $0x58] ss:$0 sm:$0xff] }
 0x107   : > { %v2985_v39 = vpop.permute.xlu2 %812  ;;  %v785_v56 = vadd.f32 %v777_v25, %v697_v50  ;;  %v857_v52 = vadd.f32 %v849_v16, %v769_v45  ;;  %v4110_v13 = vperm.slane %v2649_v14, 6  ;;  %v4072_v38 = vperm.slane %v2649_v14, 7 }
 0x108   : > { %v936_v9 = vmul.f32 %v4109_v0, %v920_v43  ;;  %v3037_v50 = vadd.f32 %v847_v1, %v767_v40  ;;  %v856_v43 = vadd.f32 %v848_v46, %v768_v33  ;;  %v953_v57 = vmul.f32 %v937_v27, %v937_v27 }
 0x109   : > { %v2988_v44 = vpop.permute.xlu1 %726  ;;  %v945_v0 = vadd.f32 %v937_v27, %v857_v52  ;;  %v921_v27 = vsel %vm916_vm6, %v2872_v41, %v2946_v37  ;;  %v2226_v37 = vld [vmem:[%s4025_s0 + $0x68] ss:$0 sm:$0xff] }
 0x10a   : > { %v2997_v10 = vpop.permute.xlu0 %912  ;;  %v746_v47 = vsel %vm740_vm4, %v2988_v44, %v2806_v31  ;;  %v830_v31 = vsel %vm828_vm5, %v2833_v30, %v2897_v32  ;;  %v2225_v30 = vld [vmem:[%s4025_s0 + $0x60] ss:$0 sm:$0xff]  ;;  %v952_v16 = vmul.f32 %v936_v9, %v936_v9  ;;  %v944_v1 = vadd.f32 %v936_v9, %v856_v43 }
 0x10b   : > { %v758_v12 = vmul.f32 %v4071_v29, %v746_v47  ;;  %v864_v47 = vmul.f32 %v848_v46, %v848_v46  ;;  %v850_v3 = vmul.f32 %v4110_v13, %v830_v31  ;;  %v918_v40 = vsel %vm916_vm6, %v2854_v18, %v2997_v10 }
 0x10c   : > { %v834_v46 = vsel %vm828_vm5, %v2930_v26, %v2851_v2  ;;  %v4073_v2 = vperm.slane %v2818_v35, 5 }
 0x10d   : > { %v3018_v58 = vadd.f32 %v758_v12, %v655_v54  ;;  %v774_v61 = vmul.f32 %v758_v12, %v758_v12  ;;  %v3039_v54 = vadd.f32 %v863_v34, %v783_v5  ;;  %v872_v45 = vadd.f32 %v864_v47, %v784_v28 }
 0x10e   : > { %v858_v13 = vadd.f32 %v850_v3, %v770_v36  ;;  %v4112_v36 = vperm.slane %v2618_v53, 7 }
 0x10f   : > { %v3022_v7 = vadd.f32 %v774_v61, %v694_v11  ;;  %v873_v11 = vadd.f32 %v865_v59, %v785_v56  ;;  %v3046_v61 = vpop.permute.xlu2 %900  ;;  %v866_v59 = vmul.f32 %v850_v3, %v850_v3  ;;  %v960_v56 = vadd.f32 %v952_v16, %v872_v45 }
 0x110   : > { %v935_v3 = vmul.f32 %v4112_v36, %v921_v27 }
 0x111   : > { %v997_v25 = vpop.permute.xlu1 %996  ;;  %v961_v18 = vadd.f32 %v953_v57, %v873_v11  ;;  %v3076_v11 = vadd.f32 %v2533_v60, %v2916_v42  ;;  %v874_v57 = vadd.f32 %v866_v59, %v786_v8  ;;  %v693_v59 = vadd.f32 %v2547_v6, %v2918_v20 }
 0x112   : > { %v3041_v12 = vpop.permute.xlu0 %994  ;;  %v1007_v31 = vsel %vm1004_vm7, %v997_v25, %v2888_v63 }
 0x113   : > { %v1008_v34 = vsel %vm1004_vm7, %v3041_v12, %v997_v25  ;;  %v1025_v5 = vmul.f32 %v2225_v30, %v1007_v31  ;;  %v938_v30 = vmul.f32 %v4072_v38, %v918_v40  ;;  %v4111_v31 = vperm.slane %v2774_v19, 6 }
 0x114   : > { %v1024_v33 = vmul.f32 %v3035_v55, %v1008_v34 }
 0x115   : > { %v1033_v47 = vadd.f32 %v1025_v5, %v945_v0  ;;  %v1041_v28 = vmul.f32 %v1025_v5, %v1025_v5  ;;  %v846_v34 = vmul.f32 %v4111_v31, %v834_v46  ;;  %v954_v40 = vmul.f32 %v938_v30, %v938_v30  ;;  %v3116_v31 = vld [vmem:[%s4025_s0 + $0x50] ss:$0 sm:$0xff] }
 0x116   : > { %v1032_v9 = vadd.f32 %v1024_v33, %v944_v1  ;;  %v1040_v52 = vmul.f32 %v1024_v33, %v1024_v33  ;;  %v835_v5 = vsel %vm828_vm5, %v2985_v39, %v2930_v26  ;;  %v946_v27 = vadd.f32 %v938_v30, %v858_v13 }
 0x117   : > { %v1049_v43 = vadd.f32 %v1041_v28, %v961_v18  ;;  %v1057_v25 = vmul.f32 0.11111111, %v1033_v47  ;;  %v862_v33 = vmul.f32 %v846_v34, %v846_v34  ;;  %v951_v47 = vmul.f32 %v935_v3, %v935_v3 }
 0x118   : > { %v1048_v29 = vadd.f32 %v1040_v52, %v960_v56  ;;  %v3069_v48 = vmul.f32 0.11111111, %v1032_v9  ;;  %v4113_v28 = vperm.slane %v2818_v35, 6  ;;  %v962_v52 = vadd.f32 %v954_v40, %v874_v57 }
 0x119   : > { %v1065_v45 = vmul.f32 0.11111111, %v1049_v43  ;;  %v1073_v16 = vmul.f32 %v1057_v25, %v1057_v25  ;;  %v3080_v0 = vpop.permute.xlu1 %724  ;;  %v4075_v13 = vperm.slane %v2877_v24, 1  ;;  %v4074_v43 = vperm.slane %v2882_v49, 1 }
 0x11a   : > { %v1064_v1 = vmul.f32 0.11111111, %v1048_v29  ;;  %v1072_v46 = vmul.f32 %v3069_v48, %v3069_v48  ;;  %v3088_v42 = vpop.permute.xlu0 %1000  ;;  %v3096_v29 = vpop.permute.xlu2 %988  ;;  %v3100_v56 = vmul.f32 %v4113_v28, %v835_v5 }
 0x11b   : > { %v1081_v60 = vsub.f32 %v1065_v45, %v1073_v16  ;;  %v1006_v8 = vsel %vm1004_vm7, %v2888_v63, %v3088_v42  ;;  %v747_v63 = vsel %vm740_vm4, %v3080_v0, %v2988_v44  ;;  %v943_v45 = vadd.f32 %v935_v3, %v3037_v50 }
 0x11c   : > { %v1080_v18 = vsub.f32 %v1064_v1, %v1072_v46  ;;  %v1026_v26 = vmul.f32 %v2226_v37, %v1006_v8  ;;  %v4076_v37 = vperm.slane %v2877_v24, 7  ;;  %v757_v36 = vmul.f32 %v4073_v2, %v747_v63 }
 0x11d   : > { %v3102_v9 = vmax.f32 %v1081_v60, 0.0  ;;  %v959_v16 = vadd.f32 %v951_v47, %v3039_v54  ;;  %v3126_v40 = vmul.f32 %v3100_v56, %v3100_v56  ;;  %v4078_v1 = vperm.slane %v2877_v24, 2 }
 0x11e   : > { %v3108_v6 = vmax.f32 %v1080_v18, 0.0  ;;  %v1034_v20 = vadd.f32 %v1026_v26, %v946_v27  ;;  %v1042_v30 = vmul.f32 %v1026_v26, %v1026_v26  ;;  %v4079_v54 = vperm.slane %v2882_v49, 2 }
 0x11f   : > { %2232 = vrsqrt.f32 %v3102_v9  ;;  %v3138_v3 = vadd.f32 %v846_v34, %v3018_v58  ;;  %v773_v63 = vmul.f32 %v757_v36, %v757_v36  ;;  %v3150_v58 = vadd.f32 %v862_v33, %v3022_v7 }
 0x120   : > { %2234 = vrsqrt.f32 %v3108_v6  ;;  %v1050_v44 = vadd.f32 %v1042_v30, %v962_v52  ;;  %v1058_v57 = vmul.f32 0.11111111, %v1034_v20  ;;  %v765_v38 = vadd.f32 %v757_v36, %v3076_v11 }
 0x121   : > { %v3128_v5 = vpop.permute.xlu1 %992  ;;  %vm1173_vm9 = vcmp.eq.f32.partialorder %v3102_v9, inf  ;;  %vm1175_vm10 = vcmp.eq.f32.partialorder %v3102_v9, 0.0  ;;  %vm1161_vm11 = vcmp.eq.f32.partialorder %v3108_v6, inf  ;;  %vm1163_vm12 = vcmp.eq.f32.partialorder %v3108_v6, 0.0 }
 0x122   : > { %v1066_v46 = vmul.f32 0.11111111, %v1050_v44  ;;  %v1074_v60 = vmul.f32 %v1058_v57, %v1058_v57  ;;  %v1103_v8 = vrot.slane %v1058_v57, 4  ;;  %v403_v27 = vpop.permute.xlu0 %402  ;;  %v1009_v18 = vsel %vm1004_vm7, %v3128_v5, %v3041_v12 }
 0x123   : > { %v1023_v50 = vmul.f32 %v3116_v31, %v1009_v18  ;;  %v407_v12 = vsel %vm4086_vm1, %v403_v27, %v2839_v22  ;;  %v4084_v44 = vperm.slane %v2882_v49, 7  ;;  %v1102_v18 = vrot.slane %v3069_v48, 4 }
 0x124   : > { %v1082_v47 = vsub.f32 %v1066_v46, %v1074_v60  ;;  %v3142_v28 = vsel %vm1105_vm8, %v1057_v25, %v1103_v8  ;;  %v408_v25 = vsel %vm4086_vm1, %v2693_v62, %v403_v27  ;;  %v915_v8 = vpop.permute.xlu2 %914  ;;  %v430_v62 = vmul.f32 %v4074_v43, %v407_v12 }
 0x125   : > { %v2233_v20 = vpop.eup %2232  ;;  %v1039_v30 = vmul.f32 %v1023_v50, %v1023_v50  ;;  %v1031_v60 = vadd.f32 %v1023_v50, %v943_v45  ;;  %v429_v26 = vmul.f32 %v4075_v13, %v408_v25  ;;  %v917_v48 = vsel %vm916_vm6, %v2997_v10, %v915_v8  ;;  %v4114_v50 = vld [vmem:[#allocation6_spill] sm:$0xff] }
 0x126   : > { %v2235_v34 = vpop.eup %2234  ;;  %v1167_v57 = vmul.f32 %v2233_v20, %v3102_v9  ;;  %v3153_v46 = vmax.f32 %v1082_v47, 0.0  ;;  %v781_v47 = vadd.f32 %v773_v63, %v693_v59  ;;  %v924_v12 = vsel %vm916_vm6, %v915_v8, %v3046_v61 }
 0x127   : > { %v1155_v22 = vmul.f32 %v2235_v34, %v3108_v6  ;;  %v1047_v2 = vadd.f32 %v1039_v30, %v959_v16  ;;  %v1055_v16 = vmul.f32 0.11111111, %v1031_v60  ;;  %v4115_v30 = vld [vmem:[#allocation17_spill] sm:$0xff]  ;;  %v445_v8 = vmul.f32 %v429_v26, %v429_v26 }
 0x128   : > { %v1168_v7 = vmul.f32 %v2233_v20, %v1167_v57  ;;  %2236 = vrsqrt.f32 %v3153_v46  ;;  %v446_v13 = vmul.f32 %v430_v62, %v430_v62  ;;  %v437_v63 = vadd.f32 %v429_v26, %v2907_v23  ;;  %v4117_v26 = vld [vmem:[#allocation19_spill] sm:$0xff] }
 0x129   : > { %v1156_v52 = vmul.f32 %v2235_v34, %v1155_v22  ;;  %v491_v45 = vpop.permute.xlu1 %490  ;;  %v1063_v27 = vmul.f32 0.11111111, %v1047_v2  ;;  %v1071_v25 = vmul.f32 %v1055_v16, %v1055_v16  ;;  %v3181_v22 = vsel %vm1105_vm8, %v1055_v16, %v1102_v18  ;;  %v4116_v16 = vld [vmem:[#allocation15_spill] sm:$0xff] }
 0x12a   : > { %v1169_v11 = vmul.f32 0.5, %v1168_v7  ;;  %v495_v10 = vsel %vm494_vm2, %v491_v45, %v4115_v30  ;;  %v3185_v2 = vmul.f32 %v4076_v37, %v917_v48  ;;  %v438_v7 = vadd.f32 %v430_v62, %v2912_v4 }
 0x12b   : > { %v1157_v59 = vmul.f32 0.5, %v1156_v52  ;;  %v903_v52 = vpop.permute.xlu0 %902  ;;  %v518_v43 = vmul.f32 %v4079_v54, %v495_v10  ;;  %v1079_v18 = vsub.f32 %v1063_v27, %v1071_v25  ;;  %v496_v48 = vsel %vm494_vm2, %v4116_v16, %v491_v45 }
 0x12c   : > { %v1170_v57 = vsub.f32 1.5, %v1169_v11  ;;  %v1188_v10 = vand.u32 2147483648, %v3153_v46  ;;  %v3206_v45 = vadd.f32 %v445_v8, %v2922_v17  ;;  %v517_v23 = vmul.f32 %v4078_v1, %v496_v48 }
 0x12d   : > { %v1158_v60 = vsub.f32 1.5, %v1157_v59  ;;  %v526_v4 = vadd.f32 %v518_v43, %v438_v7  ;;  %v3198_v33 = vmax.f32 %v1079_v18, 0.0  ;;  %v534_v62 = vmul.f32 %v518_v43, %v518_v43 }
 0x12e   : > { %v2237_v30 = vpop.eup %2236  ;;  %v1171_v11 = vmul.f32 %v2233_v20, %v1170_v57  ;;  %v3202_v20 = vmul.f32 %v4084_v44, %v924_v12  ;;  %vm1185_vm13 = vcmp.eq.f32.partialorder %v3153_v46, inf  ;;  %v922_v43 = vsel %vm916_vm6, %v903_v52, %v2872_v41  ;;  %v1313_v44 = vld.sshfl [vmem:[#allocation1 + $0x20] sm:$0xff pattern:$0x75316420] }
 0x12f   : > { %v1159_v37 = vmul.f32 %v2235_v34, %v1158_v60  ;;  %v1179_v59 = vmul.f32 %v2237_v30, %v3153_v46  ;;  %v454_v34 = vadd.f32 %v446_v13, %v4117_v26  ;;  %2238 = vrsqrt.f32 %v3198_v33  ;;  %v4121_v26 = vld [vmem:[#allocation18_spill] sm:$0xff] }
 0x130   : > { %v1172_v36 = vmul.f32 %v1171_v11, %v3102_v9  ;;  %v923_v17 = vsel %vm916_vm6, %v3046_v61, %v903_v52  ;;  %vm1187_vm14 = vcmp.eq.f32.partialorder %v3153_v46, 0.0  ;;  %v3227_v13 = vmul.f32 %v3185_v2, %v3185_v2 }
 0x131   : > { %v1180_v27 = vmul.f32 %v2237_v30, %v1179_v59  ;;  %v1160_v12 = vmul.f32 %v1159_v37, %v3108_v6  ;;  %v579_v60 = vpop.permute.xlu1 %578  ;;  %v3231_v41 = vmul.f32 %v3202_v20, %v3202_v20  ;;  %v542_v7 = vadd.f32 %v534_v62, %v454_v34 }
 0x132   : > { %v1174_v57 = vsel %vm1173_vm9, %v3102_v9, %v1172_v36  ;;  %v853_v61 = vadd.f32 %v3100_v56, %v765_v38  ;;  %v869_v37 = vadd.f32 %v3126_v40, %v781_v47  ;;  %v525_v8 = vadd.f32 %v517_v23, %v437_v63 }
 0x133   : > { %v1181_v25 = vmul.f32 0.5, %v1180_v27  ;;  %v4118_v36 = vperm.slane %v2818_v35, 7  ;;  %v4119_v18 = vperm.slane %v2774_v19, 7  ;;  %v4120_v48 = vand.u32 2147483648, %v3102_v9  ;;  %v991_v56 = vpop.permute.xlu0 %990 }
 0x134   : > { %v533_v27 = vmul.f32 %v517_v23, %v517_v23  ;;  %v4077_v62 = vperm.slane %v2882_v49, 3  ;;  %v583_v38 = vsel %vm582_vm3, %v579_v60, %v4121_v26  ;;  %v1162_v47 = vsel %vm1161_vm11, %v3108_v6, %v1160_v12  ;;  %v4122_v23 = vld [vmem:[#allocation14_spill] sm:$0xff]  ;;  %v3265_v12 = vld [vmem:[%s4025_s0 + $0x48] ss:$0 sm:$0xff] }
 0x135   : > { %v1182_v52 = vsub.f32 1.5, %v1181_v25  ;;  %v933_v11 = vmul.f32 %v4118_v36, %v923_v17  ;;  %v934_v16 = vmul.f32 %v4119_v18, %v922_v43  ;;  %v1177_v59 = vsel %vm1175_vm10, %v4120_v48, %v1174_v57  ;;  %v2239_v43 = vpop.eup %2238 }
 0x136   : > { %v1152_v63 = vand.u32 2147483648, %v3198_v33  ;;  %v4080_v34 = vperm.slane %v2877_v24, 3  ;;  %v584_v57 = vsel %vm582_vm3, %v4122_v23, %v579_v60  ;;  %v606_v25 = vmul.f32 %v4077_v62, %v583_v38 }
 0x137   : > { %v1183_v40 = vmul.f32 %v2237_v30, %v1182_v52  ;;  %v949_v9 = vmul.f32 %v933_v11, %v933_v11  ;;  %v950_v17 = vmul.f32 %v934_v16, %v934_v16  ;;  %v3260_v30 = vld [vmem:[%s4025_s0 + $0x40] ss:$0 sm:$0xff]  ;;  %v1143_v36 = vmul.f32 %v2239_v43, %v3198_v33 }
 0x138   : > { %v1010_v60 = vsel %vm1004_vm7, %v991_v56, %v3128_v5  ;;  %v1011_v18 = vsel %vm1004_vm7, %v3096_v29, %v991_v56  ;;  %v4123_v48 = vand.u32 2147483648, %v3108_v6  ;;  %v941_v38 = vadd.f32 %v933_v11, %v853_v61 }
 0x139   : > { %v1184_v52 = vmul.f32 %v1183_v40, %v3153_v46  ;;  %v942_v23 = vadd.f32 %v934_v16, %v3138_v3  ;;  %v3280_v62 = vadd.f32 %v606_v25, %v526_v4  ;;  %v1144_v1 = vmul.f32 %v2239_v43, %v1143_v36 }
 0x13a   : > { %v1165_v26 = vsel %vm1163_vm12, %v4123_v48, %v1162_v47  ;;  %v605_v5 = vmul.f32 %v4080_v34, %v584_v57  ;;  %v622_v54 = vmul.f32 %v606_v25, %v606_v25  ;;  %vm1149_vm15 = vcmp.eq.f32.partialorder %v3198_v33, inf }
 0x13b   : > { %v1186_v40 = vsel %vm1185_vm13, %v3153_v46, %v1184_v52  ;;  %v957_v6 = vadd.f32 %v949_v9, %v869_v37  ;;  %v1021_v61 = vmul.f32 %v3260_v30, %v1011_v18  ;;  %v1022_v3 = vmul.f32 %v3265_v12, %v1010_v60  ;;  %v827_v9 = vpop.permute.xlu1 %826 }
 0x13c   : > { %v1189_v56 = vsel %vm1187_vm14, %v1188_v10, %v1186_v40  ;;  %v1145_v11 = vmul.f32 0.5, %v1144_v1  ;;  %vm1151_vm9 = vcmp.eq.f32.partialorder %v3198_v33, 0.0  ;;  %v958_v16 = vadd.f32 %v950_v17, %v3150_v58  ;;  %v739_v17 = vpop.permute.xlu0 %738 }
 0x13d   : > { %v1219_v4 = vadd.f32 1e-06, %v1189_v56  ;;  %v3294_v47 = vadd.f32 %v622_v54, %v542_v7  ;;  %v1029_v57 = vadd.f32 %v1021_v61, %v941_v38  ;;  %v1030_v25 = vadd.f32 %v1022_v3, %v942_v23 }
 0x13e   : > { %v1037_v52 = vmul.f32 %v1021_v61, %v1021_v61  ;;  %v1038_v46 = vmul.f32 %v1022_v3, %v1022_v3  ;;  %v1218_v10 = vadd.f32 1e-06, %v1177_v59  ;;  %v1146_v48 = vsub.f32 1.5, %v1145_v11 }
 0x13f   : > { %v1232_v36 = vrot.slane %v1219_v4, 4  ;;  %v541_v37 = vadd.f32 %v533_v27, %v3206_v45  ;;  %v1053_v40 = vmul.f32 0.11111111, %v1029_v57  ;;  %v1054_v1 = vmul.f32 0.11111111, %v1030_v25 }
 0x140   : > { %v1045_v18 = vadd.f32 %v1037_v52, %v957_v6  ;;  %v1046_v60 = vadd.f32 %v1038_v46, %v958_v16  ;;  %v1217_v58 = vadd.f32 1e-06, %v1165_v26  ;;  %v1147_v54 = vmul.f32 %v2239_v43, %v1146_v48 }
 0x141   : > { %v3298_v56 = vsel %vm1105_vm8, %v1218_v10, %v1232_v36  ;;  %v4083_v7 = vperm.slane %v2877_v24, 6  ;;  %v613_v59 = vadd.f32 %v605_v5, %v525_v8  ;;  %v4082_v38 = vperm.slane %v2882_v49, 6 }
 0x142   : > { %2240 = vrcp.f32 %v3298_v56  ;;  %v829_v45 = vsel %vm828_vm5, %v2897_v32, %v827_v9  ;;  %v1148_v27 = vmul.f32 %v1147_v54, %v3198_v33  ;;  %v1061_v23 = vmul.f32 0.11111111, %v1045_v18 }
 0x143   : > { %v1062_v6 = vmul.f32 0.11111111, %v1046_v60  ;;  %v1069_v61 = vmul.f32 %v1053_v40, %v1053_v40  ;;  %v621_v3 = vmul.f32 %v605_v5, %v605_v5  ;;  %v1070_v26 = vmul.f32 %v1054_v1, %v1054_v1 }
 0x144   : > { %v1101_v43 = vrot.slane %v1054_v1, 4  ;;  %v836_v4 = vsel %vm828_vm5, %v827_v9, %v2985_v39  ;;  %v1281_v8 = vand.u32 2147483647, %v3298_v56  ;;  %v1150_v11 = vsel %vm1149_vm15, %v3198_v33, %v1148_v27  ;;  %v4124_v9 = vld [vmem:[#allocation7_spill] sm:$0xff] }
 0x145   : > { %v1077_v16 = vsub.f32 %v1061_v23, %v1069_v61  ;;  %v3316_v32 = vmul.f32 %v4083_v7, %v829_v45  ;;  %v1283_v57 = vand.u32 2147483648, %v3298_v56  ;;  %v1153_v5 = vsel %vm1151_vm9, %v1152_v63, %v1150_v11  ;;  %v4128_v61 = vld [vmem:[#allocation11_spill] sm:$0xff] }
 0x146   : > { %v1078_v25 = vsub.f32 %v1062_v6, %v1070_v26  ;;  %v3324_v39 = vsel %vm1105_vm8, %v1053_v40, %v1101_v43  ;;  %v1231_v52 = vrot.slane %v1217_v58, 4  ;;  %v1216_v46 = vadd.f32 1e-06, %v1153_v5  ;;  %v1003_v26 = vpop.permute.xlu0 %1002  ;;  %v4129_v43 = vld [vmem:[#allocation12_spill] sm:$0xff] }
 0x147   : > { %v3326_v10 = vmax.f32 %v1077_v16, 0.0  ;;  %v3330_v36 = vmul.f32 %v4082_v38, %v836_v4  ;;  %vm1277_vm10 = vweird.f32 %v3298_v56  ;;  %v1115_v18 = vsub.f32 %v4124_v9, %v3181_v22  ;;  %v3367_v16 = vld [vmem:[%s4025_s0 + $0x78] ss:$0 sm:$0xff] }
 0x148   : > { %v2241_v48 = vpop.eup %2240  ;;  %v629_v33 = vadd.f32 %v621_v3, %v541_v37  ;;  %v3335_v63 = vmax.f32 %v1078_v25, 0.0  ;;  %vm3338_vm11 = vcmp.eq.f32.partialorder %v1281_v8, 8.507059e+37  ;;  %v3343_v1 = vsel %vm1105_vm8, %v1216_v46, %v1231_v52  ;;  %v4127_v37 = vld [vmem:[#allocation10_spill] sm:$0xff]  ;;  %v4130_v8 = vld [vmem:[#allocation13_spill] sm:$0xff] }
 0x149   : > { %v1273_v60 = vmul.f32 %v2241_v48, %v3298_v56  ;;  %2242 = vrsqrt.f32 %v3326_v10  ;;  %v1284_v58 = vor.u32 1.1754944e-38, %v1283_v57  ;;  %v867_v54 = vmul.f32 %v3316_v32, %v3316_v32 }
 0x14a   : > { %2244 = vrcp.f32 %v3343_v1  ;;  %v660_v45 = vadd.f32 %v4127_v37, %v613_v59  ;;  %v1268_v23 = vand.u32 2147483648, %v3343_v1  ;;  %v868_v6 = vmul.f32 %v3330_v36, %v3330_v36  ;;  %v3362_v59 = vld [vmem:[%s4025_s0 + $0x70] ss:$0 sm:$0xff] }
 0x14b   : > { %v1274_v27 = vsub.f32 1.0, %v1273_v60  ;;  %v661_v3 = vadd.f32 %v4128_v61, %v3280_v62  ;;  %vm1278_vm12 = vweird.f32 %v2241_v48  ;;  %2246 = vrsqrt.f32 %v3335_v63 }
 0x14c   : > { %v699_v4 = vadd.f32 %v4129_v43, %v629_v33  ;;  %v700_v11 = vadd.f32 %v4130_v8, %v3294_v47  ;;  %v1266_v57 = vand.u32 2147483647, %v3343_v1  ;;  %v4081_v25 = vperm.slane %v2877_v24, 5  ;;  %v4131_v47 = vld [vmem:[#allocation16_spill] sm:$0xff]  ;;  %vm1279_vm14 = vmor %vm1277_vm10, %vm1278_vm12 }
 0x14d   : > { %v1275_v62 = vmul.f32 %v2241_v48, %v1274_v27  ;;  %v4085_v52 = vperm.slane %v2882_v49, 5  ;;  %v741_v46 = vsel %vm740_vm4, %v4131_v47, %v739_v17  ;;  %v748_v33 = vsel %vm740_vm4, %v739_v17, %v3080_v0 }
 0x14e   : > { %v1005_v60 = vsel %vm1004_vm7, %v3088_v42, %v1003_v26  ;;  %vm1262_vm13 = vweird.f32 %v3343_v1  ;;  %v1269_v61 = vor.u32 1.1754944e-38, %v1268_v23  ;;  %v763_v43 = vmul.f32 %v4081_v25, %v741_v46 }
 0x14f   : > { %v2243_v37 = vpop.eup %2242  ;;  %v1276_v27 = vadd.f32 %v2241_v48, %v1275_v62  ;;  %v1012_v8 = vsel %vm1004_vm7, %v1003_v26, %v3096_v29  ;;  %v764_v42 = vmul.f32 %v4085_v52, %v748_v33  ;;  %v1027_v17 = vmul.f32 %v3362_v59, %v1005_v60  ;;  %v3397_v26 = vld.sshfl [vmem:[#allocation1 + $0x28] sm:$0xff pattern:$0x75316420] }
 0x150   : > { %v2245_v47 = vpop.eup %2244  ;;  %v1119_v0 = vmul.f32 %v2243_v37, %v3326_v10  ;;  %v1028_v23 = vmul.f32 %v3367_v16, %v1012_v8  ;;  %v771_v34 = vadd.f32 %v763_v43, %v660_v45  ;;  %v779_v7 = vmul.f32 %v763_v43, %v763_v43 }
 0x151   : > { %v1280_v62 = vsel %vm1279_vm14, %v2241_v48, %v1276_v27  ;;  %v1258_v46 = vmul.f32 %v2245_v47, %v3343_v1  ;;  %vm1263_vm15 = vweird.f32 %v2245_v47  ;;  %v2247_v29 = vpop.eup %2246  ;;  %v772_v38 = vadd.f32 %v764_v42, %v661_v3 }
 0x152   : > { %v1285_v56 = vsel %vm3338_vm11, %v1284_v58, %v1280_v62  ;;  %v1120_v25 = vmul.f32 %v2243_v37, %v1119_v0  ;;  %v4132_v33 = vsub.f32 %v4114_v50, %v3142_v28  ;;  %v1131_v48 = vmul.f32 %v2247_v29, %v3335_v63  ;;  %vm1264_vm10 = vmor %vm1262_vm13, %vm1263_vm15 }
 0x153   : > { %v1259_v8 = vsub.f32 1.0, %v1258_v46  ;;  %v780_v27 = vmul.f32 %v764_v42, %v764_v42  ;;  %vm1125_vm9 = vcmp.eq.f32.partialorder %v3326_v10, inf  ;;  %v787_v45 = vadd.f32 %v779_v7, %v699_v4  ;;  %v1311_v4 = vld.sshfl [vmem:[#allocation1 + $0x10] sm:$0xff pattern:$0x75316420] }
 0x154   : > { %v1286_v60 = vmul.f32 %v1285_v56, %v4132_v33  ;;  %v1121_v52 = vmul.f32 0.5, %v1120_v25  ;;  %v859_v5 = vadd.f32 %v3316_v32, %v771_v34  ;;  %v860_v40 = vadd.f32 %v3330_v36, %v772_v38 }
 0x155   : > { %v1260_v58 = vmul.f32 %v2245_v47, %v1259_v8  ;;  %v1132_v3 = vmul.f32 %v2247_v29, %v1131_v48  ;;  %v788_v43 = vadd.f32 %v780_v27, %v700_v11  ;;  %v1043_v0 = vmul.f32 %v1027_v17, %v1027_v17 }
 0x156   : > { %1334 = vst [vmem:[#allocation1 + $0x21] ss:$2 sm:$0xff] %v1286_v60  ;;  %v1122_v62 = vsub.f32 1.5, %v1121_v52  ;;  %v875_v28 = vadd.f32 %v867_v54, %v787_v45  ;;  %v947_v50 = vadd.f32 %v3185_v2, %v859_v5  ;;  %v948_v46 = vadd.f32 %v3202_v20, %v860_v40  ;;  %v1312_v52 = vld.sshfl [vmem:[#allocation1 + $0x18] sm:$0xff pattern:$0x75316420] }
 0x157   : > { %v1261_v42 = vadd.f32 %v2245_v47, %v1260_v58  ;;  %v1133_v25 = vmul.f32 0.5, %v1132_v3  ;;  %v876_v56 = vadd.f32 %v868_v6, %v788_v43  ;;  %v1044_v33 = vmul.f32 %v1028_v23, %v1028_v23 }
 0x158   : > { %v1123_v34 = vmul.f32 %v2243_v37, %v1122_v62  ;;  %v963_v7 = vadd.f32 %v3227_v13, %v875_v28  ;;  %v1035_v38 = vadd.f32 %v1027_v17, %v947_v50  ;;  %v1036_v32 = vadd.f32 %v1028_v23, %v948_v46 }
 0x159   : > { %v1265_v36 = vsel %vm1264_vm10, %v2245_v47, %v1261_v42  ;;  %vm1267_vm11 = vcmp.eq.f32.partialorder %v1266_v57, 8.507059e+37  ;;  %v1134_v54 = vsub.f32 1.5, %v1133_v25  ;;  %v964_v2 = vadd.f32 %v3231_v41, %v876_v56 }
 0x15a   : > { %v1270_v20 = vsel %vm1267_vm11, %v1269_v61, %v1265_v36  ;;  %v1124_v11 = vmul.f32 %v1123_v34, %v3326_v10  ;;  %v1051_v6 = vadd.f32 %v1043_v0, %v963_v7  ;;  %v1059_v5 = vmul.f32 0.11111111, %v1035_v38 }
 0x15b   : > { %v1271_v1 = vmul.f32 %v1270_v20, %v1115_v18  ;;  %v1135_v37 = vmul.f32 %v2247_v29, %v1134_v54  ;;  %v1052_v13 = vadd.f32 %v1044_v33, %v964_v2  ;;  %v1060_v17 = vmul.f32 0.11111111, %v1036_v32 }
 0x15c   : > { %vm1137_vm12 = vcmp.eq.f32.partialorder %v3335_v63, inf  ;;  %v1067_v57 = vmul.f32 0.11111111, %v1051_v6  ;;  %v1075_v47 = vmul.f32 %v1059_v5, %v1059_v5  ;;  %v1126_v41 = vsel %vm1125_vm9, %v3326_v10, %v1124_v11 }
 0x15d   : > { %v1341_v23 = vld.sshfl [vmem:[#allocation1 + $0x20] sm:$0xff pattern:$0x75316420]  ;;  %v1136_v61 = vmul.f32 %v1135_v37, %v3335_v63  ;;  %v1068_v60 = vmul.f32 0.11111111, %v1052_v13  ;;  %v1076_v8 = vmul.f32 %v1060_v17, %v1060_v17  ;;  %v1140_v22 = vand.u32 2147483648, %v3335_v63 }
 0x15e   : > { %1332 = vst [vmem:[#allocation1 + $0x11] ss:$2 sm:$0xff] %v1271_v1  ;;  %v1083_v9 = vsub.f32 %v1067_v57, %v1075_v47  ;;  %v1104_v18 = vrot.slane %v1060_v17, 4  ;;  %v3426_v29 = vsel %vm1105_vm8, %v1313_v44, %v1341_v23  ;;  %vm1127_vm13 = vcmp.eq.f32.partialorder %v3326_v10, 0.0  ;;  %v4134_v37 = vld [vmem:[#allocation8_spill] sm:$0xff] }
 0x15f   : > { %v1138_v48 = vsel %vm1137_vm12, %v3335_v63, %v1136_v61  ;;  %vm1139_vm14 = vcmp.eq.f32.partialorder %v3335_v63, 0.0  ;;  %v1084_v27 = vsub.f32 %v1068_v60, %v1076_v8  ;;  %1657 = vrot.lane.b32.xlu0 %v3426_v29, %s2331_s26  ;;  %v4133_v45 = vand.u32 2147483648, %v3326_v10  ;;  %v1309_v60 = vld.sshfl [vmem:[#allocation1] sm:$0xff pattern:$0x75316420] }
 0x160   : > { %v1141_v58 = vsel %vm1139_vm14, %v1140_v22, %v1138_v48  ;;  %v3435_v3 = vmax.f32 %v1083_v9, 0.0  ;;  %v3438_v43 = vsel %vm1105_vm8, %v1059_v5, %v1104_v18  ;;  %v1114_v13 = vsub.f32 %v4134_v37, %v3324_v39  ;;  %v1310_v48 = vld.sshfl [vmem:[#allocation1 + $0x8] sm:$0xff pattern:$0x75316420] }
 0x161   : > { %v1129_v40 = vsel %vm1127_vm13, %v4133_v45, %v1126_v41  ;;  %v1215_v44 = vadd.f32 1e-06, %v1141_v58  ;;  %v1092_v0 = vmax.f32 %v1084_v27, 0.0 }
 0x162   : > { %2248 = vrsqrt.f32 %v3435_v3  ;;  %v1214_v62 = vadd.f32 1e-06, %v1129_v40  ;;  %vm1197_vm10 = vcmp.eq.f32.partialorder %v3435_v3, inf  ;;  %v1200_v41 = vand.u32 2147483648, %v3435_v3 }
 0x163   : > { %v1230_v28 = vrot.slane %v1215_v44, 4  ;;  %2250 = vrsqrt.f32 %v1092_v0  ;;  %vm1209_vm12 = vcmp.eq.f32.partialorder %v1092_v0, inf  ;;  %v1212_v9 = vand.u32 2147483648, %v1092_v0 }
 0x164   : > { %vm1199_vm14 = vcmp.eq.f32.partialorder %v3435_v3, 0.0  ;;  %vm1211_vm1 = vcmp.eq.f32.partialorder %v1092_v0, 0.0 }
 0x165   : > { %v1339_v63 = vld.sshfl [vmem:[#allocation1 + $0x10] sm:$0xff pattern:$0x75316420]  ;;  %v1234_v50 = vsel %vm1105_vm8, %v1214_v62, %v1230_v28  ;;  %v1340_v10 = vld.sshfl [vmem:[#allocation1 + $0x18] sm:$0xff pattern:$0x75316420] }
 0x166   : > { %v3443_v46 = vsel %vm1105_vm8, %v1311_v4, %v1339_v63  ;;  %2252 = vrcp.f32 %v1234_v50  ;;  %v3448_v42 = vsel %vm1105_vm8, %v1312_v52, %v1340_v10  ;;  %v1253_v11 = vand.u32 2147483648, %v1234_v50 }
 0x167   : > { %1653 = vrot.lane.b32.xlu1 %v3443_v46, %s2331_s26  ;;  %1577 = vrot.lane.b32.xlu0 %v3426_v29, %s2329_s19  ;;  %v1251_v52 = vand.u32 2147483647, %v1234_v50  ;;  %vm1247_vm9 = vweird.f32 %v1234_v50 }
 0x168   : > { %v2249_v25 = vpop.eup %2248  ;;  %1655 = vrot.lane.b32.xlu2 %v3448_v42, %s2331_s26  ;;  %v1254_v23 = vor.u32 1.1754944e-38, %v1253_v11  ;;  %v1316_v11 = vld.sshfl [vmem:[#allocation1 + $0x38] sm:$0xff pattern:$0x75316420] }
 0x169   : > { %v2251_v56 = vpop.eup %2250  ;;  %v1191_v33 = vmul.f32 %v2249_v25, %v3435_v3  ;;  %vm1252_vm13 = vcmp.eq.f32.partialorder %v1251_v52, 8.507059e+37 }
 0x16a   : > { %v1203_v34 = vmul.f32 %v2251_v56, %v1092_v0 }
 0x16b   : > { %v1192_v7 = vmul.f32 %v2249_v25, %v1191_v33 }
 0x16c   : > { %v2253_v38 = vpop.eup %2252  ;;  %v1204_v32 = vmul.f32 %v2251_v56, %v1203_v34 }
 0x16d   : > { %v1243_v36 = vmul.f32 %v2253_v38, %v1234_v50  ;;  %v1193_v54 = vmul.f32 0.5, %v1192_v7  ;;  %vm1248_vm15 = vweird.f32 %v2253_v38 }
 0x16e   : > { %v1205_v2 = vmul.f32 0.5, %v1204_v32  ;;  %vm1249_vm11 = vmor %vm1247_vm9, %vm1248_vm15 }
 0x16f   : > { %1573 = vrot.lane.b32.xlu1 %v3443_v46, %s2329_s19  ;;  %v1244_v4 = vsub.f32 1.0, %v1243_v36  ;;  %v1194_v20 = vsub.f32 1.5, %v1193_v54  ;;  %1617 = vrot.lane.b32.xlu0 %v3426_v29, %s2330_s20  ;;  %v4135_v36 = vld [vmem:[#allocation9_spill] sm:$0xff] }
 0x170   : > { %v1206_v6 = vsub.f32 1.5, %v1205_v2  ;;  %1575 = vrot.lane.b32.xlu2 %v3448_v42, %s2329_s19  ;;  %v1117_v54 = vsub.f32 %v4135_v36, %v3438_v43  ;;  %v4139_v36 = vperm.slane %v2618_v53, 7 }
 0x171   : > { %v1245_v5 = vmul.f32 %v2253_v38, %v1244_v4  ;;  %v1195_v1 = vmul.f32 %v2249_v25, %v1194_v20  ;;  %v1315_v20 = vld.sshfl [vmem:[#allocation1 + $0x30] sm:$0xff pattern:$0x75316420] }
 0x172   : > { %v1207_v17 = vmul.f32 %v2251_v56, %v1206_v6 }
 0x173   : > { %v1246_v57 = vadd.f32 %v2253_v38, %v1245_v5  ;;  %v1196_v47 = vmul.f32 %v1195_v1, %v3435_v3 }
 0x174   : > { %v1208_v61 = vmul.f32 %v1207_v17, %v1092_v0 }
 0x175   : > { %v1250_v8 = vsel %vm1249_vm11, %v2253_v38, %v1246_v57  ;;  %v1198_v22 = vsel %vm1197_vm10, %v3435_v3, %v1196_v47  ;;  %vm4152_vm11 = vcmp.lt.s32.totalorder %v2569_v21, 16 }
 0x176   : > { %v1255_v39 = vsel %vm1252_vm13, %v1254_v23, %v1250_v8  ;;  %v1210_v18 = vsel %vm1209_vm12, %v1092_v0, %v1208_v61  ;;  %v1201_v45 = vsel %vm1199_vm14, %v1200_v41, %v1198_v22  ;;  %v1342_v61 = vld.sshfl [vmem:[#allocation1 + $0x28] sm:$0xff pattern:$0x75316420]  ;;  %vm4155_vm12 = vmmov %vm4152_vm11  ;;  %vm1820_vm13 = vcmask 588800  }
 0x177   : > { %1613 = vrot.lane.b32.xlu1 %v3443_v46, %s2330_s20  ;;  %v1256_v27 = vmul.f32 %v1255_v39, %v1114_v13  ;;  %v1213_v40 = vsel %vm1211_vm1, %v1212_v9, %v1210_v18  ;;  %1533 = vrot.lane.b32.xlu0 %v3443_v46, %s2328_s18  ;;  %v1220_v44 = vadd.f32 1e-06, %v1201_v45  ;;  %v3564_v22 = vsel %vm1105_vm8, %v3397_v26, %v1342_v61 }
 0x178   : > { %v1221_v58 = vadd.f32 1e-06, %v1213_v40  ;;  %1615 = vrot.lane.b32.xlu2 %v3448_v42, %s2330_s20 }
 0x179   : > { %1330 = vst [vmem:[#allocation1 + $0x1] ss:$2 sm:$0xff] %v1256_v27 }
 0x17a   : > { %v1233_v62 = vrot.slane %v1221_v58, 4 }
 0x17c   : > { %v1237_v3 = vsel %vm1105_vm8, %v1220_v44, %v1233_v62 }
 0x17d   : > { %2254 = vrcp.f32 %v1237_v3  ;;  %v1298_v33 = vand.u32 2147483648, %v1237_v3  ;;  %v1296_v7 = vand.u32 2147483647, %v1237_v3  ;;  %vm1292_vm15 = vweird.f32 %v1237_v3 }
 0x17f   : > { %v1299_v32 = vor.u32 1.1754944e-38, %v1298_v33  ;;  %vm1297_vm10 = vcmp.eq.f32.partialorder %v1296_v7, 8.507059e+37 }
 0x180   : > { %v1338_v0 = vld.sshfl [vmem:[#allocation1 + $0x8] sm:$0xff pattern:$0x75316420]  ;;  %v1337_v28 = vld.sshfl [vmem:[#allocation1] sm:$0xff pattern:$0x75316420] }
 0x181   : > { %v3476_v63 = vsel %vm1105_vm8, %v1310_v48, %v1338_v0  ;;  %v3479_v50 = vsel %vm1105_vm8, %v1309_v60, %v1337_v28  ;;  %v4137_v28 = vperm.slane %v2613_v51, 7 }
 0x182   : > { %1651 = vrot.lane.b32.xlu2 %v3476_v63, %s2331_s26  ;;  %1649 = vrot.lane.b32.xlu1 %v3479_v50, %s2331_s26 }
 0x183   : > { %v2255_v10 = vpop.eup %2254  ;;  %1569 = vrot.lane.b32.xlu0 %v3479_v50, %s2329_s19 }
 0x184   : > { %v1288_v25 = vmul.f32 %v2255_v10, %v1237_v3  ;;  %vm1293_vm1 = vweird.f32 %v2255_v10  ;;  %v4136_v3 = vperm.slane %v2613_v51, 6 }
 0x185   : > { %vm1294_vm9 = vmor %vm1292_vm15, %vm1293_vm1  ;;  %vm2071_vm1 = vcmask 1042432  }
 0x186   : > { %v1289_v56 = vsub.f32 1.0, %v1288_v25 }
 0x188   : > { %v1290_v34 = vmul.f32 %v2255_v10, %v1289_v56 }
 0x18a   : > { %v1291_v38 = vadd.f32 %v2255_v10, %v1290_v34  ;;  %1537 = vrot.lane.b32.xlu2 %v3426_v29, %s2328_s18  ;;  %1535 = vrot.lane.b32.xlu1 %v3448_v42, %s2328_s18 }
 0x18b   : > { %1611 = vrot.lane.b32.xlu0 %v3476_v63, %s2330_s20 }
 0x18c   : > { %v1295_v2 = vsel %vm1294_vm9, %v2255_v10, %v1291_v38  ;;  %v4138_v38 = vperm.slane %v2618_v53, 6 }
 0x18d   : > { %v1300_v4 = vsel %vm1297_vm10, %v1299_v32, %v1295_v2 }
 0x18e   : > { %v1301_v6 = vmul.f32 %v1300_v4, %v1117_v54 }
 0x190   : > { %1336 = vst [vmem:[#allocation1 + $0x31] ss:$2 sm:$0xff] %v1301_v6 }
 0x192   : > { %1609 = vrot.lane.b32.xlu2 %v3479_v50, %s2330_s20  ;;  %1571 = vrot.lane.b32.xlu1 %v3476_v63, %s2329_s19 }
 0x193   : > { %1447 = vrot.lane.b32.xlu0 %v3448_v42, %s2326_s16 }
 0x197   : > { %v1343_v43 = vld.sshfl [vmem:[#allocation1 + $0x30] sm:$0xff pattern:$0x75316420]  ;;  %v1344_v52 = vld.sshfl [vmem:[#allocation1 + $0x38] sm:$0xff pattern:$0x75316420] }
 0x198   : > { %v3512_v5 = vsel %vm1105_vm8, %v1315_v20, %v1343_v43  ;;  %v3523_v1 = vsel %vm1105_vm8, %v1316_v11, %v1344_v52 }
 0x19a   : > { %1445 = vrot.lane.b32.xlu2 %v3443_v46, %s2326_s16  ;;  %1443 = vrot.lane.b32.xlu1 %v3476_v63, %s2326_s16 }
 0x19b   : > { %1487 = vrot.lane.b32.xlu0 %v3448_v42, %s2327_s17 }
 0x1a2   : > { %1485 = vrot.lane.b32.xlu2 %v3443_v46, %s2327_s17  ;;  %1483 = vrot.lane.b32.xlu1 %v3476_v63, %s2327_s17 }
 0x1a3   : > { %1661 = vrot.lane.b32.xlu0 %v3512_v5, %s2331_s26 }
 0x1aa   : > { %1531 = vrot.lane.b32.xlu2 %v3476_v63, %s2328_s18  ;;  %1529 = vrot.lane.b32.xlu1 %v3479_v50, %s2328_s18 }
 0x1ab   : > { %1365 = vrot.lane.b32.xlu0 %v3443_v46, %s2324_s14 }
 0x1b2   : > { %1363 = vrot.lane.b32.xlu2 %v3476_v63, %s2324_s14  ;;  %1663 = vrot.lane.b32.xlu1 %v3523_v1, %s2331_s26 }
 0x1b3   : > { %1405 = vrot.lane.b32.xlu0 %v3443_v46, %s2325_s15 }
 0x1ba   : > { %1403 = vrot.lane.b32.xlu2 %v3476_v63, %s2325_s15  ;;  %1367 = vrot.lane.b32.xlu1 %v3448_v42, %s2324_s14 }
 0x1bb   : > { %1455 = vrot.lane.b32.xlu0 %v3523_v1, %s2326_s16 }
 0x1c2   : > { %1441 = vrot.lane.b32.xlu2 %v3479_v50, %s2326_s16  ;;  %1407 = vrot.lane.b32.xlu1 %v3448_v42, %s2325_s15  ;;  %v1656_v37 = vpop.permute.xlu2 %1655 }
 0x1c3   : > { %1581 = vrot.lane.b32.xlu0 %v3512_v5, %s2329_s19 }
 0x1ca   : > { %1495 = vrot.lane.b32.xlu2 %v3523_v1, %s2327_s17  ;;  %1481 = vrot.lane.b32.xlu1 %v3479_v50, %s2327_s17  ;;  %v1576_v13 = vpop.permute.xlu2 %1575 }
 0x1cb   : > { %1623 = vrot.lane.b32.xlu0 %v3523_v1, %s2330_s20 }
 0x1d1   : > { %v3549_v17 = vpop.permute.xlu0 %1657 }
 0x1d2   : > { %1621 = vrot.lane.b32.xlu2 %v3512_v5, %s2330_s20  ;;  %1583 = vrot.lane.b32.xlu1 %v3523_v1, %s2329_s19  ;;  %v1616_v57 = vpop.permute.xlu2 %1615  ;;  %v1668_v47 = vsel %vm1004_vm7, %v1656_v37, %v3549_v17 }
 0x1d3   : > { %1375 = vrot.lane.b32.xlu0 %v3523_v1, %s2324_s14  ;;  %v1676_v23 = vmul.f32 %v3035_v55, %v1668_v47 }
 0x1d5   : > { %v1798_v41 = vpack.c.bf16 %v1676_v23, %v1676_v23 }
 0x1d7   : > { %v1834_v60 = vsel %vm1105_vm8, %v1798_v41, 0 }
 0x1d8   : > { %1893 = vmatpush.bf16.msra.mxu3 %v1834_v60  ;;  %v4140_v60 = vperm.slane %v2618_v53, 5 }
 0x1d9   : > { %v1654_v8 = vpop.permute.xlu1 %1653  ;;  %v3568_v39 = vpop.permute.xlu0 %1577 }
 0x1da   : > { %v1669_v9 = vsel %vm1004_vm7, %v1654_v8, %v1656_v37  ;;  %1361 = vrot.lane.b32.xlu2 %v3479_v50, %s2324_s14  ;;  %1659 = vrot.lane.b32.xlu1 %v3564_v22, %s2331_s26  ;;  %v1588_v40 = vsel %vm828_vm5, %v1576_v13, %v3568_v39 }
 0x1db   : > { %v1675_v55 = vmul.f32 %v3116_v31, %v1669_v9  ;;  %1541 = vrot.lane.b32.xlu0 %v3512_v5, %s2328_s18  ;;  %v1596_v0 = vmul.f32 %v1588_v40, %v4136_v3  ;;  %v4141_v9 = vperm.slane %v2613_v51, 5  ;;  %v4143_v3 = vperm.slane %v2774_v19, 7 }
 0x1dc   : > { %v1652_v18 = vpop.permute.xlu2 %1651 }
 0x1dd   : > { %v1797_v48 = vpack.c.bf16 %v1675_v55, %v1675_v55  ;;  %v1670_v26 = vsel %vm1004_vm7, %v1652_v18, %v1654_v8 }
 0x1de   : > { %v1674_v27 = vmul.f32 %v3265_v12, %v1670_v26 }
 0x1df   : > { %v1831_v45 = vsel %vm1105_vm8, %v1797_v48, 0 }
 0x1e0   : > { %1879 = vmatpush.bf16.msra.mxu2 %v1831_v45  ;;  %v1796_v58 = vpack.c.bf16 %v1674_v27, %v1674_v27 }
 0x1e1   : > { %v1574_v44 = vpop.permute.xlu1 %1573  ;;  %v3584_v31 = vpop.permute.xlu0 %1617 }
 0x1e2   : > { %1415 = vrot.lane.b32.xlu2 %v3523_v1, %s2325_s15  ;;  %1401 = vrot.lane.b32.xlu1 %v3479_v50, %s2325_s15  ;;  %v1828_v62 = vsel %vm1105_vm8, %v1796_v58, 0  ;;  %v1628_v12 = vsel %vm916_vm6, %v1616_v57, %v3584_v31  ;;  %v1589_v33 = vsel %vm828_vm5, %v1574_v44, %v1576_v13 }
 0x1e3   : > { %1865 = vmatpush.bf16.msra.mxu1 %v1828_v62  ;;  %1619 = vrot.lane.b32.xlu0 %v3564_v22, %s2330_s20  ;;  %v1636_v10 = vmul.f32 %v1628_v12, %v4137_v28  ;;  %v1595_v32 = vmul.f32 %v1589_v33, %v4138_v38  ;;  %v4145_v33 = vperm.slane %v2774_v19, 6  ;;  %v4146_v38 = vperm.slane %v2774_v19, 5 }
 0x1e4   : > { %v3600_v25 = vpop.permute.xlu2 %1537 }
 0x1e5   : > { %v1790_v56 = vpack.c.bf16 %v1636_v10, %v1596_v0  ;;  %v4144_v10 = vperm.slane %v2818_v35, 6 }
 0x1e7   : > { %1894 = vmatpush.bf16.msra.mxu3 %v1790_v56 }
 0x1e9   : > { %v1614_v34 = vpop.permute.xlu1 %1613  ;;  %v1534_v2 = vpop.permute.xlu0 %1533 }
 0x1ea   : > { %v1629_v7 = vsel %vm916_vm6, %v1614_v34, %v1616_v57  ;;  %1579 = vrot.lane.b32.xlu2 %v3564_v22, %s2329_s19  ;;  %1543 = vrot.lane.b32.xlu1 %v3523_v1, %s2328_s18 }
 0x1eb   : > { %v1635_v54 = vmul.f32 %v1629_v7, %v4139_v36  ;;  %1491 = vrot.lane.b32.xlu0 %v3564_v22, %s2327_s17 }
 0x1ec   : > { %v3616_v4 = vpop.permute.xlu2 %1609 }
 0x1ed   : > { %v1789_v20 = vpack.c.bf16 %v1635_v54, %v1595_v32 }
 0x1ef   : > { %1880 = vmatpush.bf16.msra.mxu2 %v1789_v20 }
 0x1f2   : > { %1453 = vrot.lane.b32.xlu2 %v3512_v5, %s2326_s16  ;;  %1451 = vrot.lane.b32.xlu1 %v3564_v22, %s2326_s16 }
 0x1f3   : > { %1371 = vrot.lane.b32.xlu0 %v3564_v22, %s2324_s14 }
 0x1f4   : > { %v1446_v11 = vpop.permute.xlu2 %1445  ;;  %v3624_v6 = vpop.permute.xlu1 %1649 }
 0x1f5   : > { %v1671_v43 = vsel %vm1004_vm7, %v3624_v6, %v1652_v18  ;;  %v3629_v52 = vpop.permute.xlu0 %1569 }
 0x1f6   : > { %v1673_v37 = vmul.f32 %v3260_v30, %v1671_v43 }
 0x1f8   : > { %v1795_v13 = vpack.c.bf16 %v1673_v37, %v1673_v37 }
 0x1fa   : > { %1539 = vrot.lane.b32.xlu2 %v3564_v22, %s2328_s18  ;;  %1493 = vrot.lane.b32.xlu1 %v3512_v5, %s2327_s17  ;;  %v1825_v57 = vsel %vm1105_vm8, %v1795_v13, 0  ;;  %v4147_v13 = vperm.slane %v2613_v51, 2 }
 0x1fb   : > { %1851 = vmatpush.bf16.msra.mxu0 %v1825_v57  ;;  %1413 = vrot.lane.b32.xlu0 %v3512_v5, %s2325_s15 }
 0x1fc   : > { %v1486_v47 = vpop.permute.xlu2 %1485  ;;  %v1536_v23 = vpop.permute.xlu1 %1535 }
 0x1fd   : > { %v1548_v41 = vsel %vm740_vm4, %v1536_v23, %v3600_v25  ;;  %v1549_v30 = vsel %vm740_vm4, %v1534_v2, %v1536_v23  ;;  %v1612_v61 = vpop.permute.xlu0 %1611  ;;  %v4148_v23 = vperm.slane %v2613_v51, 3 }
 0x1fe   : > { %v1555_v8 = vmul.f32 %v1549_v30, %v4140_v60  ;;  %v1556_v55 = vmul.f32 %v1548_v41, %v4141_v9  ;;  %v1631_v26 = vsel %vm916_vm6, %v3616_v4, %v1612_v61  ;;  %v1630_v27 = vsel %vm916_vm6, %v1612_v61, %v1614_v34 }
 0x1ff   : > { %v1634_v0 = vmul.f32 %v1630_v27, %v4143_v3 }
 0x200   : > { %v1781_v18 = vpack.c.bf16 %v1555_v8, %v3443_v46  ;;  %v1782_v48 = vpack.c.bf16 %v1556_v55, %v3448_v42  ;;  %v4142_v42 = vperm.slane %v2818_v35, 7  ;;  %v4149_v55 = vperm.slane %v2618_v53, 2 }
 0x202   : > { %1411 = vrot.lane.b32.xlu2 %v3564_v22, %s2325_s15  ;;  %1373 = vrot.lane.b32.xlu1 %v3512_v5, %s2324_s14  ;;  %v1633_v40 = vmul.f32 %v1631_v26, %v4142_v42 }
 0x203   : > { %1881 = vmatpush.bf16.msra.mxu2 %v1781_v18  ;;  %1895 = vmatpush.bf16.msra.mxu3 %v1782_v48  ;;  %v4150_v48 = vperm.slane %v2618_v53, 3 }
 0x204   : > { %v1532_v45 = vpop.permute.xlu2 %1531  ;;  %1369 = vrot.lane.b32.xlu0 %v3426_v29, %s2324_s14  ;;  %v1572_v46 = vpop.permute.xlu1 %1571 }
 0x205   : > { %v1590_v58 = vsel %vm828_vm5, %v1572_v46, %v1574_v44  ;;  %v1591_v62 = vsel %vm828_vm5, %v3629_v52, %v1572_v46  ;;  %v3668_v12 = vpop.permute.xlu0 %1447  ;;  %v1550_v28 = vsel %vm740_vm4, %v1532_v45, %v1534_v2 }
 0x206   : > { %v1593_v56 = vmul.f32 %v1591_v62, %v4144_v10  ;;  %v1594_v34 = vmul.f32 %v1590_v58, %v4145_v33  ;;  %v1554_v32 = vmul.f32 %v1550_v28, %v4146_v38  ;;  %v1461_v36 = vsel %vm494_vm2, %v1446_v11, %v3668_v12 }
 0x207   : > { %v1468_v57 = vmul.f32 %v1461_v36, %v4147_v13 }
 0x208   : > { %v1787_v7 = vpack.c.bf16 %v1633_v40, %v1593_v56  ;;  %v1788_v44 = vpack.c.bf16 %v1634_v0, %v1594_v34  ;;  %v1780_v43 = vpack.c.bf16 %v1554_v32, %v3476_v63 }
 0x20a   : > { %1489 = vrot.lane.b32.xlu2 %v3426_v29, %s2327_s17  ;;  %1449 = vrot.lane.b32.xlu1 %v3426_v29, %s2326_s16  ;;  %s2169_s17 = sshll.u32 %s2390_s25, 2 }
 0x20b   : > { %1852 = vmatpush.bf16.msra.mxu0 %v1787_v7  ;;  %1866 = vmatpush.bf16.msra.mxu1 %v1788_v44  ;;  %v4154_v7 = vperm.slane %v2618_v53, 1  ;;  %s2085_s20 = scalar_lea.hbm %s4031_s6, %s2169_s17 }
 0x20c   : > { %v3687_v54 = vpop.permute.xlu2 %1363  ;;  %v1444_v2 = vpop.permute.xlu1 %1443  ;;  %s2089_s12 = sshll.u32 %s2085_s20, 4  ;;  %s2090_s12 = int_to_ptr.hbm [resolvable:$true] %s2089_s12 }
 0x20d   : > { %v3689_v20 = vpop.permute.xlu0 %1487  ;;  %v1462_v61 = vsel %vm494_vm2, %v1444_v2, %v1446_v11  ;;  %s2274_s13 = sshra.s32 %s2090_s12, 4  ;;  %s2275_s13 = int_to_ptr.hbm [resolvable:$true] %s2274_s13 }
 0x20e   : > { %v1501_v37 = vsel %vm582_vm3, %v1486_v47, %v3689_v20  ;;  %v1467_v18 = vmul.f32 %v1462_v61, %v4149_v55  ;;  %s2276_s28 = scalar_lea.hbm %s2275_s13, 4  ;;  %p2281_p0 = scmp.lt.s32.totalorder %s2275_s13, %s4031_s6 }
 0x20f   : > { %v1508_v41 = vmul.f32 %v1501_v37, %v4148_v23  ;;  %1867 = vmatpush.bf16.msra.mxu1 %v1780_v43  ;;  %p2277_p11 = scmp.ne.s32.totalorder %s2275_s13, %s2276_s28  ;;  %p2282_p1 = scmp.lt.s32.totalorder %s2280_s10, %s2276_s28 }
 0x211   : > { %v1774_v30 = vpack.c.bf16 %v1508_v41, %v1468_v57  ;;  %p2278_p12 = pnand %p2277_p11, %p2407_p5  ;;  %p2283_p2 = por %p2282_p1, %p2281_p0 }
 0x212   : > { %1409 = vrot.lane.b32.xlu1 %v3426_v29, %s2325_s15  ;;  %s243_s15 = sand.u32 1, %s2314_s22  }
 0x213   : > { %1896 = vmatpush.bf16.msra.mxu3 %v1774_v30  ;;  %s2153_s16 = sshll.u32 %s243_s15, 2  ;;  %s2075_s25 = scalar_lea.sflag [#allocation4], %s243_s15 }
 0x214   : > { %v3703_v63 = vpop.permute.xlu2 %1403  ;;  %v1484_v60 = vpop.permute.xlu1 %1483  ;;  %s245_s26 = scalar_lea.vmem [#allocation3], %s2153_s16  ;;  %p2279_p13 = pneg %p2278_p12 }
 0x215   : > { %v1502_v8 = vsel %vm582_vm3, %v1484_v60, %v1486_v47  ;;  %v3707_v9 = vpop.permute.xlu0 %1661  ;;  %v4151_v47 = vperm.slane %v2818_v35, 5  ;;  %s2087_s11 = sshll.u32 %s245_s26, 4  ;;  %s2088_s11 = int_to_ptr.vmem [resolvable:$true] %s2087_s11 }
 0x216   : > { %v1507_v26 = vmul.f32 %v1502_v8, %v4150_v48  ;;  %v4156_v8 = vperm.slane %v2613_v51, 0  ;;  %p2284_p3 = pnand %p2283_p2, %p2279_p13 }
 0x218   : > { %v1773_v27 = vpack.c.bf16 %v1507_v26, %v1467_v18 }
 0x21a   : > { %1882 = vmatpush.bf16.msra.mxu2 %v1773_v27 }
 0x21c   : > { %v1442_v46 = vpop.permute.xlu2 %1441  ;;  %v3713_v42 = vpop.permute.xlu1 %1529 }
 0x21d   : > { %v1551_v11 = vsel %vm740_vm4, %v3713_v42, %v1532_v45  ;;  %v1366_v40 = vpop.permute.xlu0 %1365  ;;  %v1463_v27 = vsel %vm494_vm2, %v1442_v46, %v1444_v2  ;;  %v4159_v2 = vperm.slane %v2818_v35, 2 }
 0x21e   : > { %v1553_v58 = vmul.f32 %v1551_v11, %v4151_v47  ;;  %v1382_v3 = vsel %vm318_vm0, %v3687_v54, %v1366_v40 }
 0x220   : > { %v1779_v62 = vpack.c.bf16 %v1553_v58, %v3479_v50  ;;  %v4153_v50 = vperm.slane %v2618_v53, 0 }
 0x222   : > { %1853 = vmatpush.bf16.msra.mxu0 %v1779_v62  ;;  %v1387_v34 = vmul.f32 %v1382_v3, %v4153_v50  ;;  %v4158_v3 = vperm.slane %v2774_v19, 2 }
 0x224   : > { %v3724_v0 = vpop.permute.xlu2 %1495  ;;  %v1664_v28 = vpop.permute.xlu1 %1663 }
 0x225   : > { %v1665_v10 = vsel %vm1004_vm7, %v3707_v9, %v1664_v28  ;;  %v1406_v56 = vpop.permute.xlu0 %1405  ;;  %v1672_v13 = vsel %vm1004_vm7, %v1664_v28, %v3624_v6  ;;  %v4157_v6 = vperm.slane %v2613_v51, 1  ;;  %v1466_v28 = vmul.f32 %v1463_v27, %v4158_v3  ;;  %v2258_v3 = vld [vmem:[%s4025_s0 + $0x60] ss:$0 sm:$0xff] }
 0x226   : > { %v1679_v45 = vmul.f32 %v3362_v59, %v1665_v10  ;;  %v1422_v33 = vsel %vm4152_vm11, %v3703_v63, %v1406_v56  ;;  %v1680_v57 = vmul.f32 %v3367_v16, %v1672_v13 }
 0x227   : > { %v1427_v44 = vmul.f32 %v1422_v33, %v4154_v7 }
 0x228   : > { %v1801_v38 = vpack.c.bf16 %v1679_v45, %v1679_v45  ;;  %v1802_v16 = vpack.c.bf16 %v1680_v57, %v1680_v57  ;;  %v4161_v45 = vperm.slane %v2774_v19, 3 }
 0x229   : > { %v1765_v32 = vpack.c.bf16 %v1427_v44, %v1387_v34 }
 0x22a   : > { %v1843_v36 = vsel %vm1105_vm8, %v1801_v38, 0  ;;  %v1846_v26 = vsel %vm1105_vm8, %v1802_v16, 0 }
 0x22b   : > { %1883 = vmatpush.bf16.msra.mxu2 %v1765_v32 }
 0x22c   : > { %v3738_v43 = vpop.permute.xlu2 %1621  ;;  %v3740_v37 = vpop.permute.xlu1 %1367 }
 0x22d   : > { %v3742_v59 = vpop.permute.xlu0 %1455  ;;  %v1381_v53 = vsel %vm318_vm0, %v1366_v40, %v3740_v37 }
 0x22e   : > { %v1388_v55 = vmul.f32 %v1381_v53, %v4156_v8  ;;  %v1464_v11 = vsel %vm494_vm2, %v3742_v59, %v1442_v46  ;;  %v4160_v46 = vperm.slane %v2818_v35, 3  ;;  %v4162_v53 = vperm.slane %v2877_v24, 7 }
 0x22f   : > { %1935 = vmatpush.bf16.msrb.mxu2 %v1843_v36  ;;  %v1465_v10 = vmul.f32 %v1464_v11, %v4159_v2  ;;  %v4163_v8 = vperm.slane %v2882_v49, 7 }
 0x234   : > { %v1362_v23 = vpop.permute.xlu2 %1361  ;;  %v3751_v41 = vpop.permute.xlu1 %1407 }
 0x235   : > { %v1421_v30 = vsel %vm4155_vm12, %v1406_v56, %v3751_v41  ;;  %v3756_v61 = vpop.permute.xlu0 %1581 }
 0x236   : > { %v1428_v18 = vmul.f32 %v1421_v30, %v4157_v6 }
 0x238   : > { %v1766_v48 = vpack.c.bf16 %v1428_v18, %v1388_v55  ;;  %v4165_v18 = vperm.slane %v2882_v49, 6 }
 0x23a   : > { %1897 = vmatpush.bf16.msra.mxu3 %v1766_v48 }
 0x23c   : > { %v3768_v40 = vpop.permute.xlu2 %1415  ;;  %v1482_v47 = vpop.permute.xlu1 %1481 }
 0x23d   : > { %v1503_v51 = vsel %vm582_vm3, %v1482_v47, %v1484_v60  ;;  %v1504_v58 = vsel %vm582_vm3, %v3724_v0, %v1482_v47  ;;  %v1624_v62 = vpop.permute.xlu0 %1623  ;;  %v3786_v60 = vld [vmem:[%s4027_s2] sm:$0xff] }
 0x23e   : > { %1949 = vmatpush.bf16.msrb.mxu3 %v1846_v26  ;;  %v1505_v56 = vmul.f32 %v1504_v58, %v4160_v46  ;;  %v1506_v33 = vmul.f32 %v1503_v51, %v4161_v45  ;;  %2162 = vmatmul.msk.bf16.vlgmr.msra.gmra.mxu2 %vm1820_vm13, %v3786_v60  ;;  %v1625_v7 = vsel %vm916_vm6, %v3738_v43, %v1624_v62 }
 0x23f   : > { %2163 = vmatmul.msk.bf16.vlgmr.msra.gmra.mxu3 %vm1820_vm13, %v3786_v60  ;;  %v1632_v44 = vsel %vm916_vm6, %v1624_v62, %v3616_v4  ;;  %v1639_v30 = vmul.f32 %v1625_v7, %v4162_v53  ;;  %v4164_v4 = vperm.slane %v2877_v24, 6  ;;  %v1383_v58 = vsel %vm318_vm0, %v1362_v23, %v3687_v54 }
 0x240   : > { %v1771_v50 = vpack.c.bf16 %v1505_v56, %v1465_v10  ;;  %v1772_v34 = vpack.c.bf16 %v1506_v33, %v1466_v28  ;;  %v1640_v55 = vmul.f32 %v1632_v44, %v4163_v8  ;;  %v4167_v54 = vperm.slane %v2818_v35, 0 }
 0x241   : > { %v4171_v44 = vperm.slane %v2774_v19, 1 }
 0x242   : > { %1854 = vmatpush.bf16.msra.mxu0 %v1771_v50  ;;  %1868 = vmatpush.bf16.msra.mxu1 %v1772_v34  ;;  %v4170_v34 = vperm.slane %v2818_v35, 1 }
 0x244   : > { %v1580_v38 = vpop.permute.xlu2 %1579  ;;  %v1584_v32 = vpop.permute.xlu1 %1583 }
 0x245   : > { %v1585_v36 = vsel %vm828_vm5, %v3756_v61, %v1584_v32  ;;  %v1592_v13 = vsel %vm828_vm5, %v1584_v32, %v3629_v52  ;;  %v3804_v57 = vpop.permute.xlu0 %1375  ;;  %v1587_v53 = vsel %vm828_vm5, %v3568_v39, %v1580_v38  ;;  %v1586_v35 = vsel %vm828_vm5, %v1580_v38, %v3756_v61 }
 0x246   : > { %v1599_v6 = vmul.f32 %v1585_v36, %v4164_v4  ;;  %v1600_v16 = vmul.f32 %v1592_v13, %v4165_v18  ;;  %v1384_v62 = vsel %vm318_vm0, %v3804_v57, %v1362_v23 }
 0x247   : > { %v1385_v56 = vmul.f32 %v1384_v62, %v4167_v54 }
 0x248   : > { %v1793_v48 = vpack.c.bf16 %v1639_v30, %v1599_v6  ;;  %v1794_v26 = vpack.c.bf16 %v1640_v55, %v1600_v16  ;;  %v4173_v6 = vperm.slane %v2649_v14, 7 }
 0x24a   : > { %1936 = vmatpush.bf16.msrb.mxu2 %v1793_v48  ;;  %1950 = vmatpush.bf16.msrb.mxu3 %v1794_v26  ;;  %v4175_v48 = vperm.slane %v2649_v14, 6 }
 0x24c   : > { %v3814_v27 = vpop.permute.xlu2 %1453  ;;  %v1660_v52 = vpop.permute.xlu1 %1659  ;;  %v1598_v26 = vmul.f32 %v1586_v35, %v4175_v48  ;;  %v4189_v48 = vperm.slane %v2882_v49, 0 }
 0x24d   : > { %v1542_v11 = vpop.permute.xlu0 %1541  ;;  %v1666_v47 = vsel %vm1004_vm7, %v1660_v52, %v3707_v9  ;;  %v1667_v51 = vsel %vm1004_vm7, %v3549_v17, %v1660_v52  ;;  %v2259_v9 = vld [vmem:[%s4025_s0 + $0x68] ss:$0 sm:$0xff]  ;;  %v4166_v17 = vperm.slane %v2774_v19, 0  ;;  %vm4168_vm7 = vmmov %vm4152_vm11  ;;  %v4172_v19 = vperm.slane %v2654_v15, 7 }
 0x24e   : > { %v1677_v28 = vmul.f32 %v2258_v3, %v1667_v51  ;;  %v1678_v2 = vmul.f32 %v2259_v9, %v1666_v47  ;;  %vm4169_vm14 = vmmov %vm4168_vm7  ;;  %v4176_v52 = vperm.slane %v2654_v15, 5  ;;  %v4177_v51 = vperm.slane %v2649_v14, 5 }
 0x24f   : > { %v1386_v46 = vmul.f32 %v1383_v58, %v4166_v17 }
 0x250   : > { %v1799_v36 = vpack.c.bf16 %v1677_v28, %v1677_v28  ;;  %v1800_v13 = vpack.c.bf16 %v1678_v2, %v1678_v2  ;;  %v2332_v28 = vmov 0  }
 0x251   : > { %2223 = vset.pattern.permute.xlu0 %v2332_v28  ;;  %2222 = vset.pattern.permute.xlu2 %v2332_v28  ;;  %v4191_v28 = vperm.slane %v2649_v14, 3 }
 0x252   : > { %v1837_v61 = vsel %vm1105_vm8, %v1799_v36, 0  ;;  %v1840_v38 = vsel %vm1105_vm8, %v1800_v13, 0  ;;  %v4181_v13 = vperm.slane %v2877_v24, 2  ;;  %vm2069_vm8 = vcmask 1041408  }
 0x254   : > { %v1402_v10 = vpop.permute.xlu1 %1401  ;;  %v1540_v50 = vpop.permute.xlu2 %1539 }
 0x255   : > { %v1423_v23 = vsel %vm4168_vm7, %v1402_v10, %v3703_v63  ;;  %v1424_v45 = vsel %vm4169_vm14, %v3768_v40, %v1402_v10  ;;  %v1620_v33 = vpop.permute.xlu0 %1619  ;;  %v1546_v39 = vsel %vm740_vm4, %v1540_v50, %v1542_v11 }
 0x256   : > { %v1425_v7 = vmul.f32 %v1424_v45, %v4170_v34  ;;  %v1426_v32 = vmul.f32 %v1423_v23, %v4171_v44  ;;  %v1626_v63 = vsel %vm916_vm6, %v1620_v33, %v3738_v43  ;;  %v1627_v30 = vsel %vm916_vm6, %v3584_v31, %v1620_v33  ;;  %v1803_v44 = vld [vmem:[%s4028_s3] sm:$0xff] }
 0x257   : > { %v1637_v8 = vmul.f32 %v1627_v30, %v4172_v19  ;;  %v1547_v43 = vsel %vm740_vm4, %v3600_v25, %v1540_v50  ;;  %v1638_v18 = vmul.f32 %v1626_v63, %v4173_v6  ;;  %v4174_v31 = vperm.slane %v2654_v15, 6  ;;  %v1804_v25 = vld [vmem:[%s4028_s3 + $0x8] sm:$0xff]  ;;  %1807 = vperm.xlu2 %2222, %v1803_v44  }
 0x258   : > { %v1763_v55 = vpack.c.bf16 %v1425_v7, %v1385_v56  ;;  %v1764_v4 = vpack.c.bf16 %v1426_v32, %v1386_v46  ;;  %v1557_v47 = vmul.f32 %v1547_v43, %v4176_v52  ;;  %v1558_v58 = vmul.f32 %v1546_v39, %v4177_v51  ;;  %1812 = vperm.xlu0 %2223, %v1804_v25  }
 0x259   : > { %v1597_v16 = vmul.f32 %v1587_v53, %v4174_v31  ;;  %v1792_v17 = vpack.c.bf16 %v1638_v18, %v1598_v26  ;;  %v4178_v46 = vperm.slane %v2877_v24, 5  ;;  %v4179_v56 = vperm.slane %v2882_v49, 5 }
 0x25a   : > { %1855 = vmatpush.bf16.msra.mxu0 %v1763_v55  ;;  %1869 = vmatpush.bf16.msra.mxu1 %v1764_v4  ;;  %v1783_v45 = vpack.c.bf16 %v1557_v47, %v3426_v29  ;;  %v1784_v33 = vpack.c.bf16 %v1558_v58, %v3564_v22  ;;  %v1457_v7 = vsel %vm494_vm2, %v3814_v27, %v3742_v59  ;;  %v4180_v32 = vperm.slane %v2882_v49, 2 }
 0x25b   : > { %v1791_v3 = vpack.c.bf16 %v1637_v8, %v1597_v16  ;;  %v4183_v30 = vperm.slane %v2882_v49, 3  ;;  %v4186_v18 = vperm.slane %v2877_v24, 1  ;;  %v4187_v16 = vperm.slane %v2882_v49, 1 }
 0x25c   : > { %v1544_v62 = vpop.permute.xlu1 %1543  ;;  %v1472_v36 = vmul.f32 %v1457_v7, %v4180_v32  ;;  %v1412_v59 = vpop.permute.xlu2 %1411  ;;  %v4197_v7 = vperm.slane %v2649_v14, 0  ;;  %vm2067_vm6 = vcmask 1040384  }
 0x25d   : > { %v1545_v9 = vsel %vm740_vm4, %v1542_v11, %v1544_v62  ;;  %v1552_v2 = vsel %vm740_vm4, %v1544_v62, %v3713_v42  ;;  %v1492_v10 = vpop.permute.xlu0 %1491  ;;  %2160 = vmatmul.msk.bf16.vlgmr.msra.gmra.mxu0 %vm1820_vm13, %v3786_v60  ;;  %2161 = vmatmul.msk.bf16.vlgmr.msra.gmra.mxu1 %vm1820_vm13, %v3786_v60  ;;  %vm4184_vm4 = vmmov %vm4168_vm7  ;;  %v4190_v62 = vperm.slane %v2654_v15, 3 }
 0x25e   : > { %1907 = vmatpush.bf16.msrb.mxu0 %v1837_v61  ;;  %1921 = vmatpush.bf16.msrb.mxu1 %v1840_v38  ;;  %v1559_v54 = vmul.f32 %v1545_v9, %v4178_v46  ;;  %v1560_v23 = vmul.f32 %v1552_v2, %v4179_v56  ;;  %vm4185_vm5 = vmmov %vm4184_vm4  ;;  %v4188_v38 = vperm.slane %v2877_v24, 0  ;;  %v4192_v9 = vperm.slane %v2654_v15, 2 }
 0x260   : > { %v1785_v11 = vpack.c.bf16 %v1559_v54, %v3512_v5  ;;  %v1786_v42 = vpack.c.bf16 %v1560_v23, %v3523_v1 }
 0x262   : > { %1908 = vmatpush.bf16.msrb.mxu0 %v1791_v3  ;;  %1922 = vmatpush.bf16.msrb.mxu1 %v1792_v17 }
 0x263   : > { %1937 = vmatpush.bf16.msrb.mxu2 %v1785_v11  ;;  %1951 = vmatpush.bf16.msrb.mxu3 %v1786_v42 }
 0x264   : > { %v1452_v50 = vpop.permute.xlu1 %1451  ;;  %v1490_v25 = vpop.permute.xlu2 %1489 }
 0x265   : > { %v1372_v34 = vpop.permute.xlu0 %1371  ;;  %v1458_v5 = vsel %vm494_vm2, %v1452_v50, %v3814_v27  ;;  %v4182_v27 = vperm.slane %v2877_v24, 3  ;;  %v1500_v51 = vsel %vm582_vm3, %v3689_v20, %v1490_v25 }
 0x266   : > { %1909 = vmatpush.bf16.msrb.mxu0 %v1783_v45  ;;  %1923 = vmatpush.bf16.msrb.mxu1 %v1784_v33  ;;  %v1471_v53 = vmul.f32 %v1458_v5, %v4181_v13  ;;  %v1509_v3 = vmul.f32 %v1500_v51, %v4190_v62  ;;  %v4196_v33 = vperm.slane %v2654_v15, 0 }
 0x26c   : > { %v1494_v1 = vpop.permute.xlu1 %1493 }
 0x26d   : > { %v1497_v29 = vsel %vm582_vm3, %v1494_v1, %v3724_v0  ;;  %v1498_v22 = vsel %vm582_vm3, %v1492_v10, %v1494_v1  ;;  %v1414_v35 = vpop.permute.xlu0 %1413 }
 0x26e   : > { %v1511_v63 = vmul.f32 %v1498_v22, %v4182_v27  ;;  %v1512_v0 = vmul.f32 %v1497_v29, %v4183_v30  ;;  %v1417_v55 = vsel %vm4184_vm4, %v1414_v35, %v3768_v40  ;;  %v1418_v4 = vsel %vm4185_vm5, %v1412_v59, %v1414_v35 }
 0x26f   : > { %v1431_v31 = vmul.f32 %v1418_v4, %v4186_v18  ;;  %v1432_v61 = vmul.f32 %v1417_v55, %v4187_v16  ;;  %v4199_v29 = vperm.slane %v2649_v14, 1 }
 0x270   : > { %v1777_v19 = vpack.c.bf16 %v1511_v63, %v1471_v53  ;;  %v1778_v8 = vpack.c.bf16 %v1512_v0, %v1472_v36 }
 0x272   : > { %1938 = vmatpush.bf16.msrb.mxu2 %v1777_v19  ;;  %1952 = vmatpush.bf16.msrb.mxu3 %v1778_v8 }
 0x274   : > { %v1374_v39 = vpop.permute.xlu1 %1373 }
 0x275   : > { %v1377_v43 = vsel %vm318_vm0, %v1374_v39, %v3804_v57  ;;  %v1378_v6 = vsel %vm318_vm0, %v1372_v34, %v1374_v39  ;;  %v1499_v57 = vsel %vm582_vm3, %v1490_v25, %v1492_v10  ;;  %v4193_v10 = vperm.slane %v2649_v14, 2 }
 0x276   : > { %v1391_v40 = vmul.f32 %v1378_v6, %v4188_v38  ;;  %v1392_v26 = vmul.f32 %v1377_v43, %v4189_v48  ;;  %v1510_v20 = vmul.f32 %v1499_v57, %v4191_v28  ;;  %v1370_v46 = vpop.permute.xlu0 %1369 }
 0x277   : > { %v1379_v56 = vsel %vm318_vm0, %v1370_v46, %v1372_v34  ;;  %v1380_v23 = vsel %vm318_vm0, %v3740_v37, %v1370_v46  ;;  %v4198_v34 = vperm.slane %v2654_v15, 1 }
 0x278   : > { %v1769_v52 = vpack.c.bf16 %v1431_v31, %v1391_v40  ;;  %v1770_v47 = vpack.c.bf16 %v1432_v61, %v1392_v26  ;;  %v1390_v5 = vmul.f32 %v1379_v56, %v4197_v7 }
 0x27a   : > { %1939 = vmatpush.bf16.msrb.mxu2 %v1769_v52  ;;  %1953 = vmatpush.bf16.msrb.mxu3 %v1770_v47 }
 0x27c   : > { %v1450_v58 = vpop.permute.xlu1 %1449 }
 0x27d   : > { %v1459_v24 = vsel %vm494_vm2, %v1450_v58, %v1452_v50  ;;  %v1460_v49 = vsel %vm494_vm2, %v3668_v12, %v1450_v58  ;;  %2166 = vmatmul.msk.bf16.vlgmr.msrb.gmra.mxu2 %vm1820_vm13, %v3786_v60  ;;  %2167 = vmatmul.msk.bf16.vlgmr.msrb.gmra.mxu3 %vm1820_vm13, %v3786_v60  ;;  %vm4194_vm2 = vmmov %vm4184_vm4  ;;  %v1389_v50 = vmul.f32 %v1380_v23, %v4196_v33 }
 0x27e   : > { %v1469_v2 = vmul.f32 %v1460_v49, %v4192_v9  ;;  %v1470_v17 = vmul.f32 %v1459_v24, %v4193_v10  ;;  %vm4195_vm3 = vmmov %vm4194_vm2 }
 0x280   : > { %v1775_v12 = vpack.c.bf16 %v1509_v3, %v1469_v2  ;;  %v1776_v54 = vpack.c.bf16 %v1510_v20, %v1470_v17 }
 0x282   : > { %1910 = vmatpush.bf16.msrb.mxu0 %v1775_v12  ;;  %1924 = vmatpush.bf16.msrb.mxu1 %v1776_v54 }
 0x284   : > { %v1410_v11 = vpop.permute.xlu1 %1409 }
 0x285   : > { %v1419_v42 = vsel %vm4194_vm2, %v1410_v11, %v1412_v59  ;;  %v1420_v45 = vsel %vm4195_vm3, %v3751_v41, %v1410_v11 }
 0x286   : > { %v1429_v1 = vmul.f32 %v1420_v45, %v4198_v34  ;;  %v1430_v37 = vmul.f32 %v1419_v42, %v4199_v29  ;;  %v2333_v34 = vmov 256.0  }
 0x287   : > { %2256 = vrcp.f32 %v2333_v34 }
 0x288   : > { %v1767_v22 = vpack.c.bf16 %v1429_v1, %v1389_v50  ;;  %v1768_v44 = vpack.c.bf16 %v1430_v37, %v1390_v5 }
 0x28a   : > { %1911 = vmatpush.bf16.msrb.mxu0 %v1767_v22  ;;  %1925 = vmatpush.bf16.msrb.mxu1 %v1768_v44 }
 0x28d   : > { %2164 = vmatmul.msk.bf16.vlgmr.msrb.gmra.mxu0 %vm1820_vm13, %v3786_v60  ;;  %2165 = vmatmul.msk.bf16.vlgmr.msrb.gmra.mxu1 %vm1820_vm13, %v3786_v60  ;;  %v2257_v1 = vpop.eup %2256 }
 0x28e   : > { %v1983_v29 = vmul.f32 256.0, %v2257_v1  ;;  %vm1987_vm0 = vweird.f32 %v2257_v1 }
 0x290   : > { %v1984_v37 = vsub.f32 1.0, %v1983_v29 }
 0x292   : > { %v1985_v22 = vmul.f32 %v2257_v1, %v1984_v37 }
 0x2b1   : > { %v1808_v32 = vpop.permute.xlu2 %1807 }
 0x2c1   : > { %v1885_v21 = vpop.f32.mrf.mxu2 }
 0x2c2   : > { %v1899_v41 = vpop.f32.mrf.mxu3  ;;  %v1886_v36 = vadd.f32 %v1885_v21, %v1808_v32 }
 0x2c3   : > { %v1900_v59 = vadd.f32 %v1899_v41, %v1808_v32  ;;  %v1986_v41 = vadd.f32 %v2257_v1, %v1985_v22 }
 0x2c4   : > { %v1962_v15 = vmax.f32 %v1886_v36, 0.0 }
 0x2c5   : > { %v1963_v13 = vmax.f32 %v1900_v59, 0.0 }
 0x2c7   : > { %v2004_v53 = vadd.f32 %v1963_v13, %v1962_v15  ;;  %v1992_v15 = vld [vmem:[%s4029_s4 + $0x8] sm:$0xff]  ;;  %v1991_v13 = vld [vmem:[%s4029_s4] sm:$0xff] }
 0x2c9   : > { %v1887_v14 = vpop.f32.mrf.mxu2  ;;  %2005 = vadd.xlane.f32.xlu1 %v2004_v53 }
 0x2ca   : > { %v1901_v27 = vpop.f32.mrf.mxu3  ;;  %v1813_v63 = vpop.permute.xlu0 %1812 }
 0x2cb   : > { %v1888_v30 = vadd.f32 %v1887_v14, %v1813_v63  ;;  %v1902_v0 = vadd.f32 %v1901_v27, %v1813_v63 }
 0x2cd   : > { %v1970_v35 = vmax.f32 %v1888_v30, 0.0  ;;  %v1971_v19 = vmax.f32 %v1902_v0, 0.0 }
 0x2cf   : > { %v2007_v8 = vadd.f32 %v1971_v19, %v1970_v35 }
 0x2d1   : > { %2008 = vadd.xlane.f32.xlu2 %v2007_v8 }
 0x2da   : > { %v1857_v55 = vpop.f32.mrf.mxu0  ;;  %v1871_v60 = vpop.f32.mrf.mxu1 }
 0x2db   : > { %v1858_v4 = vadd.f32 %v1857_v55, %v1808_v32  ;;  %v1872_v39 = vadd.f32 %v1871_v60, %v1808_v32 }
 0x2dd   : > { %v1960_v43 = vmax.f32 %v1858_v4, 0.0  ;;  %v1961_v6 = vmax.f32 %v1872_v39, 0.0 }
 0x2df   : > { %v1976_v18 = vadd.f32 %v1961_v6, %v1960_v43 }
 0x2e1   : > { %1977 = vadd.xlane.f32.xlu1 %v1976_v18 }
 0x2e2   : > { %v1859_v31 = vpop.f32.mrf.mxu0  ;;  %v1873_v16 = vpop.f32.mrf.mxu1 }
 0x2e3   : > { %v1860_v61 = vadd.f32 %v1859_v31, %v1813_v63  ;;  %v1874_v38 = vadd.f32 %v1873_v16, %v1813_v63 }
 0x2e5   : > { %v1968_v40 = vmax.f32 %v1860_v61, 0.0  ;;  %v1969_v48 = vmax.f32 %v1874_v38, 0.0 }
 0x2e7   : > { %v1979_v26 = vadd.f32 %v1969_v48, %v1968_v40 }
 0x2e9   : > { %1980 = vadd.xlane.f32.xlu2 %v1979_v26 }
 0x300   : > { %v1941_v25 = vpop.f32.mrf.mxu2  ;;  %v1955_v52 = vpop.f32.mrf.mxu3 }
 0x301   : > { %v1942_v47 = vadd.f32 %v1941_v25, %v1808_v32  ;;  %v1956_v57 = vadd.f32 %v1955_v52, %v1808_v32 }
 0x303   : > { %v1966_v51 = vmax.f32 %v1942_v47, 0.0  ;;  %v1967_v58 = vmax.f32 %v1956_v57, 0.0 }
 0x305   : > { %v2040_v24 = vadd.f32 %v1967_v58, %v1966_v51 }
 0x307   : > { %2041 = vadd.xlane.f32.xlu1 %v2040_v24 }
 0x308   : > { %v1943_v54 = vpop.f32.mrf.mxu2  ;;  %v1957_v56 = vpop.f32.mrf.mxu3 }
 0x309   : > { %v1944_v42 = vadd.f32 %v1943_v54, %v1813_v63  ;;  %v1958_v45 = vadd.f32 %v1957_v56, %v1813_v63  ;;  %v2002_v56 = vld [vmem:[%s4030_s5] sm:$0x1] }
 0x30a   : > { %v1913_v49 = vpop.f32.mrf.mxu0  ;;  %v1927_v62 = vpop.f32.mrf.mxu1 }
 0x30b   : > { %v1914_v3 = vadd.f32 %v1913_v49, %v1808_v32  ;;  %v1928_v28 = vadd.f32 %v1927_v62, %v1808_v32  ;;  %v1974_v50 = vmax.f32 %v1944_v42, 0.0  ;;  %v1975_v7 = vmax.f32 %v1958_v45, 0.0 }
 0x30c   : > { %v1988_v32 = vsel %vm1987_vm0, %v2257_v1, %v1986_v41 }
 0x30d   : > { %v1964_v20 = vmax.f32 %v1914_v3, 0.0  ;;  %v1965_v9 = vmax.f32 %v1928_v28, 0.0  ;;  %v2043_v5 = vadd.f32 %v1975_v7, %v1974_v50 }
 0x30f   : > { %v2022_v2 = vadd.f32 %v1965_v9, %v1964_v20 }
 0x311   : > { %2023 = vadd.xlane.f32.xlu0 %v2022_v2 }
 0x312   : > { %v1915_v10 = vpop.f32.mrf.mxu0  ;;  %v1929_v17 = vpop.f32.mrf.mxu1 }
 0x313   : > { %v1916_v46 = vadd.f32 %v1915_v10, %v1813_v63  ;;  %v1930_v12 = vadd.f32 %v1929_v17, %v1813_v63 }
 0x315   : > { %v1972_v23 = vmax.f32 %v1916_v46, 0.0  ;;  %v1973_v11 = vmax.f32 %v1930_v12, 0.0 }
 0x317   : > { %v2025_v33 = vadd.f32 %v1973_v11, %v1972_v23 }
 0x319   : > { %2026 = vadd.xlane.f32.xlu2 %v2025_v33 }
 0x321   : > { %2044 = vadd.xlane.f32.xlu2 %v2043_v5 }
 0x33c   : > { %v2006_v21 = vpop.xlane.xlu1 %2005 }
 0x33d   : > { %v2010_v59 = vmul.f32 %v2006_v21, %v1988_v32 }
 0x33f   : > { %v2012_v63 = vmul.f32 %v2010_v59, %v1991_v13 }
 0x344   : > { %v2009_v44 = vpop.xlane.xlu2 %2008 }
 0x345   : > { %v2011_v36 = vmul.f32 %v2009_v44, %v1988_v32 }
 0x347   : > { %v2013_v27 = vmul.f32 %v2011_v36, %v1992_v15 }
 0x349   : > { %v2014_v35 = vadd.f32 %v2013_v27, %v2012_v63 }
 0x34b   : > { %v2015_v60 = vrot.slane %v2014_v35, 4 }
 0x34d   : > { %v2016_v6 = vadd.f32 %v2015_v60, %v2014_v35 }
 0x34f   : > { %v2017_v40 = vrot.slane %v2016_v6, 2 }
 0x351   : > { %v2018_v57 = vadd.f32 %v2017_v40, %v2016_v6 }
 0x353   : > { %v2019_v28 = vrot.slane %v2018_v57, 1 }
 0x354   : > { %v1978_v14 = vpop.xlane.xlu1 %1977 }
 0x355   : > { %v1989_v0 = vmul.f32 %v1988_v32, %v1978_v14  ;;  %v2020_v46 = vadd.f32 %v2019_v28, %v2018_v57 }
 0x357   : > { %v1993_v8 = vmul.f32 %v1991_v13, %v1989_v0  ;;  %v2021_v42 = vadd.f32 %v2020_v46, %v2002_v56 }
 0x359   : > { %v2059_v5 = vrot.slane %v2021_v42, 7 }
 0x35c   : > { %v1981_v53 = vpop.xlane.xlu2 %1980 }
 0x35d   : > { %v1990_v30 = vmul.f32 %v1988_v32, %v1981_v53 }
 0x35f   : > { %v1994_v19 = vmul.f32 %v1992_v15, %v1990_v30 }
 0x361   : > { %v1995_v4 = vadd.f32 %v1994_v19, %v1993_v8 }
 0x363   : > { %v1996_v18 = vrot.slane %v1995_v4, 4 }
 0x365   : > { %v1997_v48 = vadd.f32 %v1996_v18, %v1995_v4 }
 0x367   : > { %v1998_v51 = vrot.slane %v1997_v48, 2 }
 0x369   : > { %v1999_v20 = vadd.f32 %v1998_v51, %v1997_v48 }
 0x36b   : > { %v2000_v12 = vrot.slane %v1999_v20, 1 }
 0x36d   : > { %v2001_v45 = vadd.f32 %v2000_v12, %v1999_v20 }
 0x36f   : > { %v2003_v34 = vadd.f32 %v2002_v56, %v2001_v45 }
 0x371   : > { %v2068_v44 = vsel %vm2067_vm6, %v2003_v34, %v2059_v5 }
 0x37a   : > { %v2042_v38 = vpop.xlane.xlu1 %2041 }
 0x37b   : > { %v2046_v25 = vmul.f32 %v2042_v38, %v1988_v32 }
 0x37d   : > { %v2048_v49 = vmul.f32 %v2046_v25, %v1991_v13 }
 0x384   : > { %v2024_v55 = vpop.xlane.xlu0 %2023 }
 0x385   : > { %v2028_v39 = vmul.f32 %v2024_v55, %v1988_v32 }
 0x387   : > { %v2030_v16 = vmul.f32 %v2028_v39, %v1991_v13 }
 0x38c   : > { %v2027_v43 = vpop.xlane.xlu2 %2026 }
 0x38d   : > { %v2029_v31 = vmul.f32 %v2027_v43, %v1988_v32 }
 0x38f   : > { %v2031_v61 = vmul.f32 %v2029_v31, %v1992_v15 }
 0x391   : > { %v2032_v26 = vadd.f32 %v2031_v61, %v2030_v16 }
 0x393   : > { %v2033_v52 = vrot.slane %v2032_v26, 4 }
 0x394   : > { %v2045_v47 = vpop.xlane.xlu2 %2044 }
 0x395   : > { %v2034_v58 = vadd.f32 %v2033_v52, %v2032_v26  ;;  %v2047_v24 = vmul.f32 %v2045_v47, %v1988_v32 }
 0x397   : > { %v2035_v62 = vrot.slane %v2034_v58, 2  ;;  %v2049_v3 = vmul.f32 %v2047_v24, %v1992_v15 }
 0x399   : > { %v2036_v9 = vadd.f32 %v2035_v62, %v2034_v58  ;;  %v2050_v2 = vadd.f32 %v2049_v3, %v2048_v49 }
 0x39b   : > { %v2037_v10 = vrot.slane %v2036_v9, 1  ;;  %v2051_v17 = vrot.slane %v2050_v2, 4 }
 0x39d   : > { %v2052_v54 = vadd.f32 %v2051_v17, %v2050_v2  ;;  %v2038_v23 = vadd.f32 %v2037_v10, %v2036_v9 }
 0x39f   : > { %v2053_v11 = vrot.slane %v2052_v54, 2  ;;  %v2039_v50 = vadd.f32 %v2038_v23, %v2002_v56 }
 0x3a1   : > { %v2054_v33 = vadd.f32 %v2053_v11, %v2052_v54  ;;  %v2062_v29 = vrot.slane %v2039_v50, 6 }
 0x3a3   : > { %v2055_v7 = vrot.slane %v2054_v33, 1  ;;  %v2070_v21 = vsel %vm2069_vm8, %v2068_v44, %v2062_v29 }
 0x3a5   : > { %v2056_v1 = vadd.f32 %v2055_v7, %v2054_v33 }
 0x3a7   : > { %v2057_v37 = vadd.f32 %v2056_v1, %v2002_v56 }
 0x3a9   : > { %v2065_v22 = vrot.slane %v2057_v37, 5 }
 0x3ab   : > { %v2072_v41 = vsel %vm2071_vm1, %v2070_v21, %v2065_v22 }
 0x3ac   : > { %2073 = vst [vmem:[%s245_s26] sm:$0xf] %v2072_v41 }
 0x3ad   : > { %2287 = shalt.err (!%p2284_p3)
}
 0x3ae   : > { %2173 = dma.vmem_to_hbm [thread:$0]  (%p2407_p5), %s2088_s11, 64, %s2090_s12, %s2075_s25  }
 0x3af PF: > { %p2179_p4 = scmp.ge.s32.totalorder %s2322_s24, 2  ;;  %s2101_s15 = sand.u32 1, %s2310_s21  }
 0x3b0   : > { %s2102_s17 = scalar_lea.sflag [#allocation4], %s2101_s15 }
 0x3b1   : > { %p2176_p7 = pnand %p2179_p4, %p2411_p6 }
 0x3b3   : > { %p2177_p8 = pneg %p2176_p7 }
 0x3b5   : > { %2305 = dma.done.wait (%p2177_p8), %s2102_s17, 64  }
 0x3b6   : > { %2307 = vsyncadd (%p2177_p8), %s2102_s17, 4294967232  ;;  %p16_p9 = scmp.ge.s32.totalorder %s2394_s27, 4   ;;  %s4200_s21 = smov %s2314_s22 }
 0x3b7   : > { %s4201_s22 = smov %s2318_s23  ;;  %s4202_s23 = smov %s2405_s30 }
 0x3b8   : > { %s4203_s24 = smov %s2394_s27  ;;  %18 = sbr.rel (!%p16_p9) target bundleno = 3 (0x3), region = 116 }
 0x3bd   :  { %2108 = vsyncpa [#allocation4], 1 }
 0x3be   :  { %2110 = vsyncpa [#allocation4 + $0x1], 1 }

</bundles_post_ra>
